<compile_context>
chip_gen: v7x
topology: tpu7x:2x2x1
jax: 0.10.0
libtpu: 0.0.40
codegen_flags: <defaults>
</compile_context>

<pallas_src>
import math

import jax
import jax.numpy as jnp
from jax import lax
from jax.experimental import pallas as pl
from jax.experimental.pallas import tpu as pltpu


# ---------------------------------------------------------------------------
# Host-side weight folding.  Call ONCE and reuse the result across forward
# calls (diffusion denoising loop) — this is deliberately outside lora_ip_attn.
# ---------------------------------------------------------------------------
def fold_weights(params, lora_scale, heads):
    """Fold the LoRA branches into dense effective weights, (in, out) layout.

    wq_eff = Wq^T (I + s Aq^T Bq^T)             -> x @ wq_eff == q + s*lora_q(q)
    wk_eff = (Ak^T Bk^T)(I + s Ak^T Bk^T)       -> ehs @ wk_eff == refined k
    wv_eff analogous.  All folds done in f32.
    """
    f32 = jnp.float32
    wq = params["wq"].astype(f32)               # nn.Linear layout (out, in)
    aq, bq = params["aq"].astype(f32), params["bq"].astype(f32)
    ak, bk = params["ak"].astype(f32), params["bk"].astype(f32)
    av, bv = params["av"].astype(f32), params["bv"].astype(f32)
    wout = params["wout"].astype(f32)
    bout = params["bout"].astype(f32).reshape(1, -1)

    H = wq.shape[0]
    C = ak.shape[1]
    # The PyTorch module re-applies the (rank, C) LoRA-down to an (.., H)
    # tensor when refining k/v, so it only works when C == H.  Documented
    # limitation: the usual cross_attention_dim != hidden_size config is not
    # servable by this processor either.
    assert C == H, "LoRAIPAttnProcessor needs cross_attention_dim == hidden_size"
    assert H % heads == 0

    eye = jnp.eye(H, dtype=f32)
    dq = aq.T @ bq.T                            # (H, H) low-rank q delta
    dk = ak.T @ bk.T                            # (C, H) base K path AND refinement
    dv = av.T @ bv.T                            # (C, H)

    return {
        "wq_eff": wq.T @ (eye + lora_scale * dq),   # (H, H)  (in, out)
        "wk_eff": dk @ (eye + lora_scale * dk),     # (C, H)
        "wv_eff": dv @ (eye + lora_scale * dv),     # (C, H)
        "wout_t": wout.T,                           # (H, H)  (in, out)
        "bout": bout,                               # (1, H)  f32
    }


# ---------------------------------------------------------------------------
# Kernel
# ---------------------------------------------------------------------------
def _make_kernel(ts, Se, H, heads, compute_dtype, exp_dtype):
    dh = H // heads
    attn_scale = 1.0 / math.sqrt(dh)
    f32 = jnp.float32
    cdt = compute_dtype

    def kernel(hs_ref, k_ref, v_ref, wq_ref, wout_ref, bout_ref, out_ref, o_stage):
        hs = hs_ref[0]                                                  # (ts, H)
        # Full-width q projection (LoRA refinement folded into wq_eff):
        # K = H contraction depth, N = H output width -> full MXU feed.
        q = jnp.dot(hs, wq_ref[...], preferred_element_type=f32)       # (ts, H) f32
        q = q.astype(cdt)

        # Per-head attention.  Static unroll; all slices below are static lane
        # slices and every intermediate dies at iteration end (results flow
        # through the o_stage staging ref, no carried accumulator).
        for h in range(heads):
            lo, hi = h * dh, (h + 1) * dh
            qh = q[:, lo:hi]                                            # (ts, dh)
            kh = k_ref[0, :, lo:hi]                                     # (Se, dh)
            vh = v_ref[0, :, lo:hi]                                     # (Se, dh)
            # q k^T without an explicit transpose op (contract last dims).
            s = lax.dot_general(qh, kh, (((1,), (1,)), ((), ())),
                                preferred_element_type=f32) * attn_scale  # (ts, Se)
            m = jnp.max(s, axis=-1, keepdims=True)                      # f32
            p = jnp.exp((s - m).astype(exp_dtype))                      # EUP slot
            denom = jnp.sum(p, axis=-1, keepdims=True, dtype=f32)       # (ts, 1) f32
            # EUP approximate reciprocal + one Newton step: ~f32 accuracy
            # without a VALU divide over the (ts, Se) probabilities.
            inv = pl.reciprocal(denom, approx=True)
            inv = inv * (2.0 - denom * inv)
            oh = jnp.dot(p.astype(cdt), vh, preferred_element_type=f32)  # (ts, dh)
            # Deferred softmax normalization on the small per-head output, then
            # stage this head's lanes of the pre-projection activation.
            o_stage[:, lo:hi] = (oh * inv).astype(cdt)

        # Single full-depth output projection: (ts, H) @ (H, H) + bias.
        out = jnp.dot(o_stage[...], wout_ref[...], preferred_element_type=f32)
        out_ref[0] = (out + bout_ref[...]).astype(out_ref.dtype)

    return kernel


# ---------------------------------------------------------------------------
# Generation-aware defaults
# ---------------------------------------------------------------------------
def _bf16_exp_supported():
    # bf16 EUP exists on v6e / v7x; keep f32 exp on v5e (and older / unknown).
    try:
        kind = jax.devices()[0].device_kind.lower()
    except Exception:
        return False
    return ("v6" in kind) or ("v7" in kind)


def _default_vmem_limit_bytes():
    try:
        cap = int(pltpu.get_tpu_info().vmem_capacity_bytes)
    except Exception:
        cap = 64 * 1024 * 1024          # assume the smaller (v7x) budget
    # Headroom under the physical per-core budget: ~56 MiB on v7x,
    # ~100 MiB on v5e/v6e (128 MiB physical).
    return int(min(max(cap - 8 * 1024 * 1024, 32 * 1024 * 1024),
                   100 * 1024 * 1024))


def _auto_seq_tile(S, vmem_limit_bytes):
    # v5e/v6e can afford ts=1024; v7x (smaller VMEM) targets 512.
    cap = 1024 if vmem_limit_bytes >= 80 * 1024 * 1024 else 512
    ts = min(S, cap)
    while ts > 8 and S % ts != 0:
        ts //= 2
    return ts if S % ts == 0 else S


# ---------------------------------------------------------------------------
# Wrapper
# ---------------------------------------------------------------------------
def lora_ip_attn(hidden_states, encoder_hidden_states, folded_or_params, *,
                 heads, lora_scale=None, seq_tile=None, compute_dtype=None,
                 weights_dtype=None, exp_dtype=None, weight_buffer_count=1,
                 vmem_limit_bytes=None):
    """Fused LoRAIPAttnProcessor forward.  Pass pre-folded weights from
    fold_weights() (preferred; fold once per denoising run), or raw params
    plus lora_scale for convenience."""
    if "wq_eff" not in folded_or_params:
        assert lora_scale is not None, "raw params need lora_scale for folding"
        folded = fold_weights(folded_or_params, lora_scale, heads)
    else:
        folded = folded_or_params

    B, S, H = hidden_states.shape
    _, Se, C = encoder_hidden_states.shape
    assert H % heads == 0

    f32 = jnp.float32
    cdt = jnp.dtype(compute_dtype or hidden_states.dtype)
    # Keep weights_dtype=f32 if you need to preserve very small LoRA deltas
    # exactly when computing in bf16 (costs 2x weight VMEM).
    wdt = jnp.dtype(weights_dtype or cdt)
    if exp_dtype is None:
        exp_dtype = cdt if (cdt == jnp.bfloat16 and _bf16_exp_supported()) else f32
    exp_dtype = jnp.dtype(exp_dtype)

    if vmem_limit_bytes is None:
        vmem_limit_bytes = _default_vmem_limit_bytes()
    ts = _auto_seq_tile(S, vmem_limit_bytes) if seq_tile is None else min(seq_tile, S)
    assert S % ts == 0, "sequence length must be divisible by the sequence tile"

    hs = hidden_states.astype(cdt)
    # K/V depend only on encoder_hidden_states: project them in XLA (tiny
    # (B, Se, C) @ (C, H) matmuls) and feed them lane-dense per batch element.
    # This removes the in-kernel pl.when(si==0) block + persistent scratch and
    # lets both grid axes be "parallel".
    ehs = encoder_hidden_states.astype(cdt)
    k = jnp.einsum("bsc,ch->bsh", ehs, folded["wk_eff"].astype(cdt),
                   preferred_element_type=f32).astype(cdt)
    v = jnp.einsum("bsc,ch->bsh", ehs, folded["wv_eff"].astype(cdt),
                   preferred_element_type=f32).astype(cdt)

    wq = folded["wq_eff"].astype(wdt)
    wout = folded["wout_t"].astype(wdt)
    bout = folded["bout"].astype(f32)

    kernel = _make_kernel(ts, Se, H, heads, cdt, exp_dtype)

    itemsize = jnp.dtype(cdt).itemsize
    flops = 2 * B * S * H * (2 * H + 2 * Se)
    cost = pl.CostEstimate(
        flops=int(flops),
        transcendentals=int(B * heads * S * Se),
        bytes_accessed=int(itemsize * (hs.size + k.size + v.size + B * S * H)
                           + jnp.dtype(wdt).itemsize * (wq.size + wout.size)
                           + 4 * bout.size),
    )

    def build_and_run(buffer_count):
        def const_spec(shape):
            imap = lambda b, s, _n=len(shape): (0,) * _n
            if buffer_count is not None:
                return pl.BlockSpec(shape, imap,
                                    pipeline_mode=pl.Buffered(buffer_count))
            return pl.BlockSpec(shape, imap)

        grid_spec = pltpu.PrefetchScalarGridSpec(
            num_scalar_prefetch=0,
            grid=(B, S // ts),
            in_specs=[
                pl.BlockSpec((1, ts, H), lambda b, s: (b, s, 0)),   # hs tile
                pl.BlockSpec((1, Se, H), lambda b, s: (b, 0, 0)),   # K (lane-dense)
                pl.BlockSpec((1, Se, H), lambda b, s: (b, 0, 0)),   # V (lane-dense)
                const_spec((H, H)),                                  # Wq_eff  (in,out)
                const_spec((H, H)),                                  # Wout^T  (in,out)
                const_spec((1, H)),                                  # bias (f32)
            ],
            out_specs=pl.BlockSpec((1, ts, H), lambda b, s: (b, s, 0)),
            scratch_shapes=[pltpu.VMEM((ts, H), cdt)],               # head staging
        )
        return pl.pallas_call(
            kernel,
            out_shape=jax.ShapeDtypeStruct((B, S, H), hidden_states.dtype),
            grid_spec=grid_spec,
            compiler_params=pltpu.CompilerParams(
                dimension_semantics=("parallel", "parallel"),
                vmem_limit_bytes=int(vmem_limit_bytes),
            ),
            cost_estimate=cost,
        )(hs, k, v, wq, wout, bout)

    if weight_buffer_count is not None:
        try:
            return build_and_run(int(weight_buffer_count))
        except Exception:
            # pipeline_mode=pl.Buffered(n) not supported by this jax version:
            # fall back to default (double) buffering of the constant weights.
            pass
    return build_and_run(None)


# ---------------------------------------------------------------------------
# Pure-JAX reference replicating the PyTorch forward (unfolded).
# ---------------------------------------------------------------------------
def ref_forward(hs, ehs, params, heads, lora_scale):
    q = hs @ params["wq"].T
    k = (ehs @ params["ak"].T) @ params["bk"].T
    v = (ehs @ params["av"].T) @ params["bv"].T
    q = q + lora_scale * ((q @ params["aq"].T) @ params["bq"].T)
    k = k + lora_scale * ((k @ params["ak"].T) @ params["bk"].T)
    v = v + lora_scale * ((v @ params["av"].T) @ params["bv"].T)
    B, S, H = q.shape
    dh = H // heads

    def head_to_batch(x):
        b, s, _ = x.shape
        return x.reshape(b, s, heads, dh).transpose(0, 2, 1, 3).reshape(b * heads, s, dh)

    qh, kh, vh = head_to_batch(q), head_to_batch(k), head_to_batch(v)
    scores = jnp.einsum("bqd,bkd->bqk", qh, kh) * (dh ** -0.5)
    probs = jax.nn.softmax(scores, axis=-1)
    o = jnp.einsum("bqk,bkd->bqd", probs, vh)
    o = o.reshape(B, heads, S, dh).transpose(0, 2, 1, 3).reshape(B, S, H)
    return o @ params["wout"].T + params["bout"]


if __name__ == "__main__":
    B, S, Se = 2, 16, 8
    H = 32            # hidden_size
    C = 32            # cross_attention_dim (== H; required by the module itself)
    heads = 4
    rank = 4
    self_scale = 0.8  # LoRAIPAttnProcessor(scale=0.8)
    fwd_scale = 0.5   # forward(..., scale=0.5)
    lora_scale = self_scale * fwd_scale

    key = jax.random.PRNGKey(0)
    keys = jax.random.split(key, 11)

    def init(k, shape, fan_in):
        # deterministic, nn.Linear-style uniform(-1/sqrt(fan_in), 1/sqrt(fan_in))
        return jax.random.uniform(k, shape, jnp.float32, -1.0, 1.0) / math.sqrt(fan_in)

    params = {
        "wq":   init(keys[0], (H, H), H),
        "aq":   init(keys[1], (rank, H), H),
        "bq":   init(keys[2], (H, rank), rank),
        "ak":   init(keys[3], (rank, C), C),
        "bk":   init(keys[4], (H, rank), rank),
        "av":   init(keys[5], (rank, C), C),
        "bv":   init(keys[6], (H, rank), rank),
        "wout": init(keys[7], (H, H), H),
        "bout": init(keys[8], (1, H), H),
    }
    hidden_states = jax.random.normal(keys[9], (B, S, H), jnp.float32)
    encoder_hidden_states = jax.random.normal(keys[10], (B, Se, C), jnp.float32)

    ref = ref_forward(hidden_states, encoder_hidden_states, params, heads, lora_scale)

    # Fold the LoRA weights ONCE and reuse across calls.
    folded = fold_weights(params, lora_scale, heads)

    # f32 path; seq_tile=8 exercises the sequence-tile grid axis.
    out = lora_ip_attn(hidden_states, encoder_hidden_states, folded,
                       heads=heads, seq_tile=8)
    out = jax.block_until_ready(out)
    assert out.shape == (B, S, H)
    err_f32 = float(jnp.max(jnp.abs(out - ref)))
    assert jnp.allclose(out, ref, atol=5e-4, rtol=5e-4), f"f32 max_err={err_f32}"

    # bf16 MXU-operand path (auto seq_tile; f32 accumulation and softmax stats,
    # exp in bf16 only where the chip has a bf16 EUP).
    out_bf16 = lora_ip_attn(hidden_states.astype(jnp.bfloat16),
                            encoder_hidden_states.astype(jnp.bfloat16),
                            folded, heads=heads)
    out_bf16 = jax.block_until_ready(out_bf16).astype(jnp.float32)
    err_bf16 = float(jnp.max(jnp.abs(out_bf16 - ref)))
    assert err_bf16 < 0.1, f"bf16 max_err={err_bf16}"

    print("KERNEL_OK")
</pallas_src>

<mosaic_0001>
module attributes {stable_mosaic.version = 11 : i64} {
  func.func @kernel(%arg0: i32, %arg1: i32, %arg2: memref<1x8x32xf32, #tpu.memory_space<vmem>>, %arg3: memref<1x8x32xf32, #tpu.memory_space<vmem>>, %arg4: memref<1x8x32xf32, #tpu.memory_space<vmem>>, %arg5: memref<32x32xf32, #tpu.memory_space<vmem>>, %arg6: memref<32x32xf32, #tpu.memory_space<vmem>>, %arg7: memref<1x32xf32, #tpu.memory_space<vmem>>, %arg8: memref<1x8x32xf32, #tpu.memory_space<vmem>>, %arg9: memref<8x32xf32, #tpu.memory_space<vmem>>) attributes {dimension_semantics = [#tpu.dimension_semantics<parallel>, #tpu.dimension_semantics<parallel>], iteration_bounds = array<i64: 2, 2>, scalar_prefetch = 0 : i64, scratch_operands = 1 : i64, tpu.core_type = #tpu.core_type<tc>, window_params = [{transform_indices = @transform_0, window_bounds = array<i64: 1, 8, 32>}, {transform_indices = @transform_1, window_bounds = array<i64: 1, 8, 32>}, {transform_indices = @transform_2, window_bounds = array<i64: 1, 8, 32>}, {pipeline_mode = #tpu.pipeline_mode<synchronous>, transform_indices = @transform_3, window_bounds = array<i64: 32, 32>}, {pipeline_mode = #tpu.pipeline_mode<synchronous>, transform_indices = @transform_4, window_bounds = array<i64: 32, 32>}, {pipeline_mode = #tpu.pipeline_mode<synchronous>, transform_indices = @transform_5, window_bounds = array<i64: 1, 32>}, {transform_indices = @transform_6, window_bounds = array<i64: 1, 8, 32>}]} {
    %c0 = arith.constant 0 : index
    %c0_0 = arith.constant 0 : index
    %c0_1 = arith.constant 0 : index
    %0 = vector.load %arg2[%c0, %c0_0, %c0_1] : memref<1x8x32xf32, #tpu.memory_space<vmem>>, vector<1x8x32xf32>
    %1 = vector.shape_cast %0 : vector<1x8x32xf32> to vector<8x32xf32>
    %c0_2 = arith.constant 0 : index
    %c0_3 = arith.constant 0 : index
    %2 = vector.load %arg5[%c0_2, %c0_3] : memref<32x32xf32, #tpu.memory_space<vmem>>, vector<32x32xf32>
    %cst = arith.constant dense<0.000000e+00> : vector<8x32xf32>
    %3 = tpu.matmul %1, %2, %cst {dimension_numbers = #tpu.dot_dimension_numbers<[1], [0], [0], [1], [0, 0, 1, 1], [], []>} : vector<8x32xf32>, vector<32x32xf32>, vector<8x32xf32> -> vector<8x32xf32>
    %4 = vector.extract_strided_slice %3 {offsets = [0, 0], sizes = [8, 8], strides = [1, 1]} : vector<8x32xf32> to vector<8x8xf32>
    %c0_4 = arith.constant 0 : index
    %c0_5 = arith.constant 0 : index
    %c0_6 = arith.constant 0 : index
    %5 = vector.load %arg3[%c0_4, %c0_5, %c0_6] : memref<1x8x32xf32, #tpu.memory_space<vmem>>, vector<1x8x8xf32>
    %6 = vector.shape_cast %5 : vector<1x8x8xf32> to vector<8x8xf32>
    %c0_7 = arith.constant 0 : index
    %c0_8 = arith.constant 0 : index
    %c0_9 = arith.constant 0 : index
    %7 = vector.load %arg4[%c0_7, %c0_8, %c0_9] : memref<1x8x32xf32, #tpu.memory_space<vmem>>, vector<1x8x8xf32>
    %8 = vector.shape_cast %7 : vector<1x8x8xf32> to vector<8x8xf32>
    %cst_10 = arith.constant dense<0.000000e+00> : vector<8x8xf32>
    %9 = tpu.matmul %4, %6, %cst_10 {dimension_numbers = #tpu.dot_dimension_numbers<[1], [1], [0], [0], [0, 0, 1, 0], [], []>} : vector<8x8xf32>, vector<8x8xf32>, vector<8x8xf32> -> vector<8x8xf32>
    %cst_11 = arith.constant 0.353553385 : f32
    %10 = vector.broadcast %cst_11 : f32 to vector<8x8xf32>
    %11 = arith.mulf %9, %10 : vector<8x8xf32>
    %cst_12 = arith.constant dense<0xFF800000> : vector<8xf32>
    %12 = vector.multi_reduction <maximumf>, %11, %cst_12 [1] : vector<8x8xf32> to vector<8xf32>
    %13 = vector.shape_cast %12 : vector<8xf32> to vector<8x1xf32>
    %14 = vector.broadcast %13 : vector<8x1xf32> to vector<8x8xf32>
    %15 = arith.subf %11, %14 : vector<8x8xf32>
    %16 = math.exp %15 : vector<8x8xf32>
    %cst_13 = arith.constant dense<0.000000e+00> : vector<8xf32>
    %17 = vector.multi_reduction <add>, %16, %cst_13 [1] : vector<8x8xf32> to vector<8xf32>
    %18 = vector.shape_cast %17 : vector<8xf32> to vector<8x1xf32>
    %19 = tpu.reciprocal %18 {approx = true} : vector<8x1xf32> -> vector<8x1xf32>
    %20 = arith.mulf %18, %19 : vector<8x1xf32>
    %cst_14 = arith.constant 2.000000e+00 : f32
    %21 = vector.broadcast %cst_14 : f32 to vector<8x1xf32>
    %22 = arith.subf %21, %20 : vector<8x1xf32>
    %23 = arith.mulf %19, %22 : vector<8x1xf32>
    %cst_15 = arith.constant dense<0.000000e+00> : vector<8x8xf32>
    %24 = tpu.matmul %16, %8, %cst_15 {dimension_numbers = #tpu.dot_dimension_numbers<[1], [0], [0], [1], [0, 0, 1, 1], [], []>} : vector<8x8xf32>, vector<8x8xf32>, vector<8x8xf32> -> vector<8x8xf32>
    %25 = vector.broadcast %23 : vector<8x1xf32> to vector<8x8xf32>
    %26 = arith.mulf %24, %25 : vector<8x8xf32>
    %c0_16 = arith.constant 0 : index
    %c0_17 = arith.constant 0 : index
    %27 = vector.load %arg9[%c0_16, %c0_17] : memref<8x32xf32, #tpu.memory_space<vmem>>, vector<8x8xf32>
    tpu.vector_store %arg9[%c0_16, %c0_17], %26 {strides = array<i32>} : memref<8x32xf32, #tpu.memory_space<vmem>>, vector<8x8xf32>,
    %28 = vector.extract_strided_slice %3 {offsets = [0, 8], sizes = [8, 8], strides = [1, 1]} : vector<8x32xf32> to vector<8x8xf32>
    %c0_18 = arith.constant 0 : index
    %c0_19 = arith.constant 0 : index
    %c8 = arith.constant 8 : index
    %29 = vector.load %arg3[%c0_18, %c0_19, %c8] : memref<1x8x32xf32, #tpu.memory_space<vmem>>, vector<1x8x8xf32>
    %30 = vector.shape_cast %29 : vector<1x8x8xf32> to vector<8x8xf32>
    %c0_20 = arith.constant 0 : index
    %c0_21 = arith.constant 0 : index
    %c8_22 = arith.constant 8 : index
    %31 = vector.load %arg4[%c0_20, %c0_21, %c8_22] : memref<1x8x32xf32, #tpu.memory_space<vmem>>, vector<1x8x8xf32>
    %32 = vector.shape_cast %31 : vector<1x8x8xf32> to vector<8x8xf32>
    %cst_23 = arith.constant dense<0.000000e+00> : vector<8x8xf32>
    %33 = tpu.matmul %28, %30, %cst_23 {dimension_numbers = #tpu.dot_dimension_numbers<[1], [1], [0], [0], [0, 0, 1, 0], [], []>} : vector<8x8xf32>, vector<8x8xf32>, vector<8x8xf32> -> vector<8x8xf32>
    %cst_24 = arith.constant 0.353553385 : f32
    %34 = vector.broadcast %cst_24 : f32 to vector<8x8xf32>
    %35 = arith.mulf %33, %34 : vector<8x8xf32>
    %cst_25 = arith.constant dense<0xFF800000> : vector<8xf32>
    %36 = vector.multi_reduction <maximumf>, %35, %cst_25 [1] : vector<8x8xf32> to vector<8xf32>
    %37 = vector.shape_cast %36 : vector<8xf32> to vector<8x1xf32>
    %38 = vector.broadcast %37 : vector<8x1xf32> to vector<8x8xf32>
    %39 = arith.subf %35, %38 : vector<8x8xf32>
    %40 = math.exp %39 : vector<8x8xf32>
    %cst_26 = arith.constant dense<0.000000e+00> : vector<8xf32>
    %41 = vector.multi_reduction <add>, %40, %cst_26 [1] : vector<8x8xf32> to vector<8xf32>
    %42 = vector.shape_cast %41 : vector<8xf32> to vector<8x1xf32>
    %43 = tpu.reciprocal %42 {approx = true} : vector<8x1xf32> -> vector<8x1xf32>
    %44 = arith.mulf %42, %43 : vector<8x1xf32>
    %cst_27 = arith.constant 2.000000e+00 : f32
    %45 = vector.broadcast %cst_27 : f32 to vector<8x1xf32>
    %46 = arith.subf %45, %44 : vector<8x1xf32>
    %47 = arith.mulf %43, %46 : vector<8x1xf32>
    %cst_28 = arith.constant dense<0.000000e+00> : vector<8x8xf32>
    %48 = tpu.matmul %40, %32, %cst_28 {dimension_numbers = #tpu.dot_dimension_numbers<[1], [0], [0], [1], [0, 0, 1, 1], [], []>} : vector<8x8xf32>, vector<8x8xf32>, vector<8x8xf32> -> vector<8x8xf32>
    %49 = vector.broadcast %47 : vector<8x1xf32> to vector<8x8xf32>
    %50 = arith.mulf %48, %49 : vector<8x8xf32>
    %c0_29 = arith.constant 0 : index
    %c8_30 = arith.constant 8 : index
    %51 = vector.load %arg9[%c0_29, %c8_30] : memref<8x32xf32, #tpu.memory_space<vmem>>, vector<8x8xf32>
    tpu.vector_store %arg9[%c0_29, %c8_30], %50 {strides = array<i32>} : memref<8x32xf32, #tpu.memory_space<vmem>>, vector<8x8xf32>,
    %52 = vector.extract_strided_slice %3 {offsets = [0, 16], sizes = [8, 8], strides = [1, 1]} : vector<8x32xf32> to vector<8x8xf32>
    %c0_31 = arith.constant 0 : index
    %c0_32 = arith.constant 0 : index
    %c16 = arith.constant 16 : index
    %53 = vector.load %arg3[%c0_31, %c0_32, %c16] : memref<1x8x32xf32, #tpu.memory_space<vmem>>, vector<1x8x8xf32>
    %54 = vector.shape_cast %53 : vector<1x8x8xf32> to vector<8x8xf32>
    %c0_33 = arith.constant 0 : index
    %c0_34 = arith.constant 0 : index
    %c16_35 = arith.constant 16 : index
    %55 = vector.load %arg4[%c0_33, %c0_34, %c16_35] : memref<1x8x32xf32, #tpu.memory_space<vmem>>, vector<1x8x8xf32>
    %56 = vector.shape_cast %55 : vector<1x8x8xf32> to vector<8x8xf32>
    %cst_36 = arith.constant dense<0.000000e+00> : vector<8x8xf32>
    %57 = tpu.matmul %52, %54, %cst_36 {dimension_numbers = #tpu.dot_dimension_numbers<[1], [1], [0], [0], [0, 0, 1, 0], [], []>} : vector<8x8xf32>, vector<8x8xf32>, vector<8x8xf32> -> vector<8x8xf32>
    %cst_37 = arith.constant 0.353553385 : f32
    %58 = vector.broadcast %cst_37 : f32 to vector<8x8xf32>
    %59 = arith.mulf %57, %58 : vector<8x8xf32>
    %cst_38 = arith.constant dense<0xFF800000> : vector<8xf32>
    %60 = vector.multi_reduction <maximumf>, %59, %cst_38 [1] : vector<8x8xf32> to vector<8xf32>
    %61 = vector.shape_cast %60 : vector<8xf32> to vector<8x1xf32>
    %62 = vector.broadcast %61 : vector<8x1xf32> to vector<8x8xf32>
    %63 = arith.subf %59, %62 : vector<8x8xf32>
    %64 = math.exp %63 : vector<8x8xf32>
    %cst_39 = arith.constant dense<0.000000e+00> : vector<8xf32>
    %65 = vector.multi_reduction <add>, %64, %cst_39 [1] : vector<8x8xf32> to vector<8xf32>
    %66 = vector.shape_cast %65 : vector<8xf32> to vector<8x1xf32>
    %67 = tpu.reciprocal %66 {approx = true} : vector<8x1xf32> -> vector<8x1xf32>
    %68 = arith.mulf %66, %67 : vector<8x1xf32>
    %cst_40 = arith.constant 2.000000e+00 : f32
    %69 = vector.broadcast %cst_40 : f32 to vector<8x1xf32>
    %70 = arith.subf %69, %68 : vector<8x1xf32>
    %71 = arith.mulf %67, %70 : vector<8x1xf32>
    %cst_41 = arith.constant dense<0.000000e+00> : vector<8x8xf32>
    %72 = tpu.matmul %64, %56, %cst_41 {dimension_numbers = #tpu.dot_dimension_numbers<[1], [0], [0], [1], [0, 0, 1, 1], [], []>} : vector<8x8xf32>, vector<8x8xf32>, vector<8x8xf32> -> vector<8x8xf32>
    %73 = vector.broadcast %71 : vector<8x1xf32> to vector<8x8xf32>
    %74 = arith.mulf %72, %73 : vector<8x8xf32>
    %c0_42 = arith.constant 0 : index
    %c16_43 = arith.constant 16 : index
    %75 = vector.load %arg9[%c0_42, %c16_43] : memref<8x32xf32, #tpu.memory_space<vmem>>, vector<8x8xf32>
    tpu.vector_store %arg9[%c0_42, %c16_43], %74 {strides = array<i32>} : memref<8x32xf32, #tpu.memory_space<vmem>>, vector<8x8xf32>,
    %76 = vector.extract_strided_slice %3 {offsets = [0, 24], sizes = [8, 8], strides = [1, 1]} : vector<8x32xf32> to vector<8x8xf32>
    %c0_44 = arith.constant 0 : index
    %c0_45 = arith.constant 0 : index
    %c24 = arith.constant 24 : index
    %77 = vector.load %arg3[%c0_44, %c0_45, %c24] : memref<1x8x32xf32, #tpu.memory_space<vmem>>, vector<1x8x8xf32>
    %78 = vector.shape_cast %77 : vector<1x8x8xf32> to vector<8x8xf32>
    %c0_46 = arith.constant 0 : index
    %c0_47 = arith.constant 0 : index
    %c24_48 = arith.constant 24 : index
    %79 = vector.load %arg4[%c0_46, %c0_47, %c24_48] : memref<1x8x32xf32, #tpu.memory_space<vmem>>, vector<1x8x8xf32>
    %80 = vector.shape_cast %79 : vector<1x8x8xf32> to vector<8x8xf32>
    %cst_49 = arith.constant dense<0.000000e+00> : vector<8x8xf32>
    %81 = tpu.matmul %76, %78, %cst_49 {dimension_numbers = #tpu.dot_dimension_numbers<[1], [1], [0], [0], [0, 0, 1, 0], [], []>} : vector<8x8xf32>, vector<8x8xf32>, vector<8x8xf32> -> vector<8x8xf32>
    %cst_50 = arith.constant 0.353553385 : f32
    %82 = vector.broadcast %cst_50 : f32 to vector<8x8xf32>
    %83 = arith.mulf %81, %82 : vector<8x8xf32>
    %cst_51 = arith.constant dense<0xFF800000> : vector<8xf32>
    %84 = vector.multi_reduction <maximumf>, %83, %cst_51 [1] : vector<8x8xf32> to vector<8xf32>
    %85 = vector.shape_cast %84 : vector<8xf32> to vector<8x1xf32>
    %86 = vector.broadcast %85 : vector<8x1xf32> to vector<8x8xf32>
    %87 = arith.subf %83, %86 : vector<8x8xf32>
    %88 = math.exp %87 : vector<8x8xf32>
    %cst_52 = arith.constant dense<0.000000e+00> : vector<8xf32>
    %89 = vector.multi_reduction <add>, %88, %cst_52 [1] : vector<8x8xf32> to vector<8xf32>
    %90 = vector.shape_cast %89 : vector<8xf32> to vector<8x1xf32>
    %91 = tpu.reciprocal %90 {approx = true} : vector<8x1xf32> -> vector<8x1xf32>
    %92 = arith.mulf %90, %91 : vector<8x1xf32>
    %cst_53 = arith.constant 2.000000e+00 : f32
    %93 = vector.broadcast %cst_53 : f32 to vector<8x1xf32>
    %94 = arith.subf %93, %92 : vector<8x1xf32>
    %95 = arith.mulf %91, %94 : vector<8x1xf32>
    %cst_54 = arith.constant dense<0.000000e+00> : vector<8x8xf32>
    %96 = tpu.matmul %88, %80, %cst_54 {dimension_numbers = #tpu.dot_dimension_numbers<[1], [0], [0], [1], [0, 0, 1, 1], [], []>} : vector<8x8xf32>, vector<8x8xf32>, vector<8x8xf32> -> vector<8x8xf32>
    %97 = vector.broadcast %95 : vector<8x1xf32> to vector<8x8xf32>
    %98 = arith.mulf %96, %97 : vector<8x8xf32>
    %c0_55 = arith.constant 0 : index
    %c24_56 = arith.constant 24 : index
    %99 = vector.load %arg9[%c0_55, %c24_56] : memref<8x32xf32, #tpu.memory_space<vmem>>, vector<8x8xf32>
    tpu.vector_store %arg9[%c0_55, %c24_56], %98 {strides = array<i32>} : memref<8x32xf32, #tpu.memory_space<vmem>>, vector<8x8xf32>,
    %c0_57 = arith.constant 0 : index
    %c0_58 = arith.constant 0 : index
    %100 = vector.load %arg9[%c0_57, %c0_58] : memref<8x32xf32, #tpu.memory_space<vmem>>, vector<8x32xf32>
    %c0_59 = arith.constant 0 : index
    %c0_60 = arith.constant 0 : index
    %101 = vector.load %arg6[%c0_59, %c0_60] : memref<32x32xf32, #tpu.memory_space<vmem>>, vector<32x32xf32>
    %cst_61 = arith.constant dense<0.000000e+00> : vector<8x32xf32>
    %102 = tpu.matmul %100, %101, %cst_61 {dimension_numbers = #tpu.dot_dimension_numbers<[1], [0], [0], [1], [0, 0, 1, 1], [], []>} : vector<8x32xf32>, vector<32x32xf32>, vector<8x32xf32> -> vector<8x32xf32>
    %c0_62 = arith.constant 0 : index
    %c0_63 = arith.constant 0 : index
    %103 = vector.load %arg7[%c0_62, %c0_63] : memref<1x32xf32, #tpu.memory_space<vmem>>, vector<1x32xf32>
    %104 = vector.broadcast %103 : vector<1x32xf32> to vector<8x32xf32>
    %105 = arith.addf %102, %104 : vector<8x32xf32>
    %c0_64 = arith.constant 0 : index
    %c0_65 = arith.constant 0 : index
    %c0_66 = arith.constant 0 : index
    %106 = vector.load %arg8[%c0_64, %c0_65, %c0_66] : memref<1x8x32xf32, #tpu.memory_space<vmem>>, vector<1x8x32xf32>
    %107 = vector.shape_cast %106 : vector<1x8x32xf32> to vector<8x32xf32>
    %108 = vector.shape_cast %105 : vector<8x32xf32> to vector<1x8x32xf32>
    tpu.vector_store %arg8[%c0_64, %c0_65, %c0_66], %108 {strides = array<i32>} : memref<1x8x32xf32, #tpu.memory_space<vmem>>, vector<1x8x32xf32>,
    return
  }
  func.func @transform_0(%arg0: i32, %arg1: i32) -> (i32, i32, i32) {
    %c0_i32 = arith.constant 0 : i32
    %c0_i32_0 = arith.constant 0 : i32
    return %arg0, %arg1, %c0_i32 : i32, i32, i32
  }
  func.func @transform_1(%arg0: i32, %arg1: i32) -> (i32, i32, i32) {
    %c0_i32 = arith.constant 0 : i32
    %c0_i32_0 = arith.constant 0 : i32
    %c0_i32_1 = arith.constant 0 : i32
    return %arg0, %c0_i32, %c0_i32_0 : i32, i32, i32
  }
  func.func @transform_2(%arg0: i32, %arg1: i32) -> (i32, i32, i32) {
    %c0_i32 = arith.constant 0 : i32
    %c0_i32_0 = arith.constant 0 : i32
    %c0_i32_1 = arith.constant 0 : i32
    return %arg0, %c0_i32, %c0_i32_0 : i32, i32, i32
  }
  func.func @transform_3(%arg0: i32, %arg1: i32) -> (i32, i32) {
    %c0_i32 = arith.constant 0 : i32
    %c0_i32_0 = arith.constant 0 : i32
    %c0_i32_1 = arith.constant 0 : i32
    return %c0_i32, %c0_i32_0 : i32, i32
  }
  func.func @transform_4(%arg0: i32, %arg1: i32) -> (i32, i32) {
    %c0_i32 = arith.constant 0 : i32
    %c0_i32_0 = arith.constant 0 : i32
    %c0_i32_1 = arith.constant 0 : i32
    return %c0_i32, %c0_i32_0 : i32, i32
  }
  func.func @transform_5(%arg0: i32, %arg1: i32) -> (i32, i32) {
    %c0_i32 = arith.constant 0 : i32
    %c0_i32_0 = arith.constant 0 : i32
    %c0_i32_1 = arith.constant 0 : i32
    return %c0_i32, %c0_i32_0 : i32, i32
  }
  func.func @transform_6(%arg0: i32, %arg1: i32) -> (i32, i32, i32) {
    %c0_i32 = arith.constant 0 : i32
    %c0_i32_0 = arith.constant 0 : i32
    return %arg0, %arg1, %c0_i32 : i32, i32, i32
  }
}

module attributes {stable_mosaic.version = 11 : i64} {
  func.func @kernel(%arg0: i32, %arg1: i32, %arg2: memref<1x8x32xf32, #tpu.memory_space<vmem>>, %arg3: memref<1x8x32xf32, #tpu.memory_space<vmem>>, %arg4: memref<1x8x32xf32, #tpu.memory_space<vmem>>, %arg5: memref<32x32xf32, #tpu.memory_space<vmem>>, %arg6: memref<32x32xf32, #tpu.memory_space<vmem>>, %arg7: memref<1x32xf32, #tpu.memory_space<vmem>>, %arg8: memref<1x8x32xf32, #tpu.memory_space<vmem>>, %arg9: memref<8x32xf32, #tpu.memory_space<vmem>>) attributes {dimension_semantics = [#tpu.dimension_semantics<parallel>, #tpu.dimension_semantics<parallel>], iteration_bounds = array<i64: 2, 2>, scalar_prefetch = 0 : i64, scratch_operands = 1 : i64, tpu.core_type = #tpu.core_type<tc>, window_params = [{transform_indices = @transform_0, window_bounds = array<i64: 1, 8, 32>}, {transform_indices = @transform_1, window_bounds = array<i64: 1, 8, 32>}, {transform_indices = @transform_2, window_bounds = array<i64: 1, 8, 32>}, {pipeline_mode = #tpu.pipeline_mode<synchronous>, transform_indices = @transform_3, window_bounds = array<i64: 32, 32>}, {pipeline_mode = #tpu.pipeline_mode<synchronous>, transform_indices = @transform_4, window_bounds = array<i64: 32, 32>}, {pipeline_mode = #tpu.pipeline_mode<synchronous>, transform_indices = @transform_5, window_bounds = array<i64: 1, 32>}, {transform_indices = @transform_6, window_bounds = array<i64: 1, 8, 32>}]} {
    %c0 = arith.constant 0 : index
    %c0_0 = arith.constant 0 : index
    %c0_1 = arith.constant 0 : index
    %0 = vector.load %arg2[%c0, %c0_0, %c0_1] : memref<1x8x32xf32, #tpu.memory_space<vmem>>, vector<1x8x32xf32>
    %1 = vector.shape_cast %0 : vector<1x8x32xf32> to vector<8x32xf32>
    %c0_2 = arith.constant 0 : index
    %c0_3 = arith.constant 0 : index
    %2 = vector.load %arg5[%c0_2, %c0_3] : memref<32x32xf32, #tpu.memory_space<vmem>>, vector<32x32xf32>
    %cst = arith.constant dense<0.000000e+00> : vector<8x32xf32>
    %3 = tpu.matmul %1, %2, %cst {dimension_numbers = #tpu.dot_dimension_numbers<[1], [0], [0], [1], [0, 0, 1, 1], [], []>} : vector<8x32xf32>, vector<32x32xf32>, vector<8x32xf32> -> vector<8x32xf32>
    %4 = vector.extract_strided_slice %3 {offsets = [0, 0], sizes = [8, 8], strides = [1, 1]} : vector<8x32xf32> to vector<8x8xf32>
    %c0_4 = arith.constant 0 : index
    %c0_5 = arith.constant 0 : index
    %c0_6 = arith.constant 0 : index
    %5 = vector.load %arg3[%c0_4, %c0_5, %c0_6] : memref<1x8x32xf32, #tpu.memory_space<vmem>>, vector<1x8x8xf32>
    %6 = vector.shape_cast %5 : vector<1x8x8xf32> to vector<8x8xf32>
    %c0_7 = arith.constant 0 : index
    %c0_8 = arith.constant 0 : index
    %c0_9 = arith.constant 0 : index
    %7 = vector.load %arg4[%c0_7, %c0_8, %c0_9] : memref<1x8x32xf32, #tpu.memory_space<vmem>>, vector<1x8x8xf32>
    %8 = vector.shape_cast %7 : vector<1x8x8xf32> to vector<8x8xf32>
    %cst_10 = arith.constant dense<0.000000e+00> : vector<8x8xf32>
    %9 = tpu.matmul %4, %6, %cst_10 {dimension_numbers = #tpu.dot_dimension_numbers<[1], [1], [0], [0], [0, 0, 1, 0], [], []>} : vector<8x8xf32>, vector<8x8xf32>, vector<8x8xf32> -> vector<8x8xf32>
    %cst_11 = arith.constant 0.353553385 : f32
    %10 = vector.broadcast %cst_11 : f32 to vector<8x8xf32>
    %11 = arith.mulf %9, %10 : vector<8x8xf32>
    %cst_12 = arith.constant dense<0xFF800000> : vector<8xf32>
    %12 = vector.multi_reduction <maximumf>, %11, %cst_12 [1] : vector<8x8xf32> to vector<8xf32>
    %13 = vector.shape_cast %12 : vector<8xf32> to vector<8x1xf32>
    %14 = vector.broadcast %13 : vector<8x1xf32> to vector<8x8xf32>
    %15 = arith.subf %11, %14 : vector<8x8xf32>
    %16 = math.exp %15 : vector<8x8xf32>
    %cst_13 = arith.constant dense<0.000000e+00> : vector<8xf32>
    %17 = vector.multi_reduction <add>, %16, %cst_13 [1] : vector<8x8xf32> to vector<8xf32>
    %18 = vector.shape_cast %17 : vector<8xf32> to vector<8x1xf32>
    %19 = tpu.reciprocal %18 {approx = true} : vector<8x1xf32> -> vector<8x1xf32>
    %20 = arith.mulf %18, %19 : vector<8x1xf32>
    %cst_14 = arith.constant 2.000000e+00 : f32
    %21 = vector.broadcast %cst_14 : f32 to vector<8x1xf32>
    %22 = arith.subf %21, %20 : vector<8x1xf32>
    %23 = arith.mulf %19, %22 : vector<8x1xf32>
    %cst_15 = arith.constant dense<0.000000e+00> : vector<8x8xf32>
    %24 = tpu.matmul %16, %8, %cst_15 {dimension_numbers = #tpu.dot_dimension_numbers<[1], [0], [0], [1], [0, 0, 1, 1], [], []>} : vector<8x8xf32>, vector<8x8xf32>, vector<8x8xf32> -> vector<8x8xf32>
    %25 = vector.broadcast %23 : vector<8x1xf32> to vector<8x8xf32>
    %26 = arith.mulf %24, %25 : vector<8x8xf32>
    %c0_16 = arith.constant 0 : index
    %c0_17 = arith.constant 0 : index
    %27 = vector.load %arg9[%c0_16, %c0_17] : memref<8x32xf32, #tpu.memory_space<vmem>>, vector<8x8xf32>
    tpu.vector_store %arg9[%c0_16, %c0_17], %26 {strides = array<i32>} : memref<8x32xf32, #tpu.memory_space<vmem>>, vector<8x8xf32>,
    %28 = vector.extract_strided_slice %3 {offsets = [0, 8], sizes = [8, 8], strides = [1, 1]} : vector<8x32xf32> to vector<8x8xf32>
    %c0_18 = arith.constant 0 : index
    %c0_19 = arith.constant 0 : index
    %c8 = arith.constant 8 : index
    %29 = vector.load %arg3[%c0_18, %c0_19, %c8] : memref<1x8x32xf32, #tpu.memory_space<vmem>>, vector<1x8x8xf32>
    %30 = vector.shape_cast %29 : vector<1x8x8xf32> to vector<8x8xf32>
    %c0_20 = arith.constant 0 : index
    %c0_21 = arith.constant 0 : index
    %c8_22 = arith.constant 8 : index
    %31 = vector.load %arg4[%c0_20, %c0_21, %c8_22] : memref<1x8x32xf32, #tpu.memory_space<vmem>>, vector<1x8x8xf32>
    %32 = vector.shape_cast %31 : vector<1x8x8xf32> to vector<8x8xf32>
    %cst_23 = arith.constant dense<0.000000e+00> : vector<8x8xf32>
    %33 = tpu.matmul %28, %30, %cst_23 {dimension_numbers = #tpu.dot_dimension_numbers<[1], [1], [0], [0], [0, 0, 1, 0], [], []>} : vector<8x8xf32>, vector<8x8xf32>, vector<8x8xf32> -> vector<8x8xf32>
    %cst_24 = arith.constant 0.353553385 : f32
    %34 = vector.broadcast %cst_24 : f32 to vector<8x8xf32>
    %35 = arith.mulf %33, %34 : vector<8x8xf32>
    %cst_25 = arith.constant dense<0xFF800000> : vector<8xf32>
    %36 = vector.multi_reduction <maximumf>, %35, %cst_25 [1] : vector<8x8xf32> to vector<8xf32>
    %37 = vector.shape_cast %36 : vector<8xf32> to vector<8x1xf32>
    %38 = vector.broadcast %37 : vector<8x1xf32> to vector<8x8xf32>
    %39 = arith.subf %35, %38 : vector<8x8xf32>
    %40 = math.exp %39 : vector<8x8xf32>
    %cst_26 = arith.constant dense<0.000000e+00> : vector<8xf32>
    %41 = vector.multi_reduction <add>, %40, %cst_26 [1] : vector<8x8xf32> to vector<8xf32>
    %42 = vector.shape_cast %41 : vector<8xf32> to vector<8x1xf32>
    %43 = tpu.reciprocal %42 {approx = true} : vector<8x1xf32> -> vector<8x1xf32>
    %44 = arith.mulf %42, %43 : vector<8x1xf32>
    %cst_27 = arith.constant 2.000000e+00 : f32
    %45 = vector.broadcast %cst_27 : f32 to vector<8x1xf32>
    %46 = arith.subf %45, %44 : vector<8x1xf32>
    %47 = arith.mulf %43, %46 : vector<8x1xf32>
    %cst_28 = arith.constant dense<0.000000e+00> : vector<8x8xf32>
    %48 = tpu.matmul %40, %32, %cst_28 {dimension_numbers = #tpu.dot_dimension_numbers<[1], [0], [0], [1], [0, 0, 1, 1], [], []>} : vector<8x8xf32>, vector<8x8xf32>, vector<8x8xf32> -> vector<8x8xf32>
    %49 = vector.broadcast %47 : vector<8x1xf32> to vector<8x8xf32>
    %50 = arith.mulf %48, %49 : vector<8x8xf32>
    %c0_29 = arith.constant 0 : index
    %c8_30 = arith.constant 8 : index
    %51 = vector.load %arg9[%c0_29, %c8_30] : memref<8x32xf32, #tpu.memory_space<vmem>>, vector<8x8xf32>
    tpu.vector_store %arg9[%c0_29, %c8_30], %50 {strides = array<i32>} : memref<8x32xf32, #tpu.memory_space<vmem>>, vector<8x8xf32>,
    %52 = vector.extract_strided_slice %3 {offsets = [0, 16], sizes = [8, 8], strides = [1, 1]} : vector<8x32xf32> to vector<8x8xf32>
    %c0_31 = arith.constant 0 : index
    %c0_32 = arith.constant 0 : index
    %c16 = arith.constant 16 : index
    %53 = vector.load %arg3[%c0_31, %c0_32, %c16] : memref<1x8x32xf32, #tpu.memory_space<vmem>>, vector<1x8x8xf32>
    %54 = vector.shape_cast %53 : vector<1x8x8xf32> to vector<8x8xf32>
    %c0_33 = arith.constant 0 : index
    %c0_34 = arith.constant 0 : index
    %c16_35 = arith.constant 16 : index
    %55 = vector.load %arg4[%c0_33, %c0_34, %c16_35] : memref<1x8x32xf32, #tpu.memory_space<vmem>>, vector<1x8x8xf32>
    %56 = vector.shape_cast %55 : vector<1x8x8xf32> to vector<8x8xf32>
    %cst_36 = arith.constant dense<0.000000e+00> : vector<8x8xf32>
    %57 = tpu.matmul %52, %54, %cst_36 {dimension_numbers = #tpu.dot_dimension_numbers<[1], [1], [0], [0], [0, 0, 1, 0], [], []>} : vector<8x8xf32>, vector<8x8xf32>, vector<8x8xf32> -> vector<8x8xf32>
    %cst_37 = arith.constant 0.353553385 : f32
    %58 = vector.broadcast %cst_37 : f32 to vector<8x8xf32>
    %59 = arith.mulf %57, %58 : vector<8x8xf32>
    %cst_38 = arith.constant dense<0xFF800000> : vector<8xf32>
    %60 = vector.multi_reduction <maximumf>, %59, %cst_38 [1] : vector<8x8xf32> to vector<8xf32>
    %61 = vector.shape_cast %60 : vector<8xf32> to vector<8x1xf32>
    %62 = vector.broadcast %61 : vector<8x1xf32> to vector<8x8xf32>
    %63 = arith.subf %59, %62 : vector<8x8xf32>
    %64 = math.exp %63 : vector<8x8xf32>
    %cst_39 = arith.constant dense<0.000000e+00> : vector<8xf32>
    %65 = vector.multi_reduction <add>, %64, %cst_39 [1] : vector<8x8xf32> to vector<8xf32>
    %66 = vector.shape_cast %65 : vector<8xf32> to vector<8x1xf32>
    %67 = tpu.reciprocal %66 {approx = true} : vector<8x1xf32> -> vector<8x1xf32>
    %68 = arith.mulf %66, %67 : vector<8x1xf32>
    %cst_40 = arith.constant 2.000000e+00 : f32
    %69 = vector.broadcast %cst_40 : f32 to vector<8x1xf32>
    %70 = arith.subf %69, %68 : vector<8x1xf32>
    %71 = arith.mulf %67, %70 : vector<8x1xf32>
    %cst_41 = arith.constant dense<0.000000e+00> : vector<8x8xf32>
    %72 = tpu.matmul %64, %56, %cst_41 {dimension_numbers = #tpu.dot_dimension_numbers<[1], [0], [0], [1], [0, 0, 1, 1], [], []>} : vector<8x8xf32>, vector<8x8xf32>, vector<8x8xf32> -> vector<8x8xf32>
    %73 = vector.broadcast %71 : vector<8x1xf32> to vector<8x8xf32>
    %74 = arith.mulf %72, %73 : vector<8x8xf32>
    %c0_42 = arith.constant 0 : index
    %c16_43 = arith.constant 16 : index
    %75 = vector.load %arg9[%c0_42, %c16_43] : memref<8x32xf32, #tpu.memory_space<vmem>>, vector<8x8xf32>
    tpu.vector_store %arg9[%c0_42, %c16_43], %74 {strides = array<i32>} : memref<8x32xf32, #tpu.memory_space<vmem>>, vector<8x8xf32>,
    %76 = vector.extract_strided_slice %3 {offsets = [0, 24], sizes = [8, 8], strides = [1, 1]} : vector<8x32xf32> to vector<8x8xf32>
    %c0_44 = arith.constant 0 : index
    %c0_45 = arith.constant 0 : index
    %c24 = arith.constant 24 : index
    %77 = vector.load %arg3[%c0_44, %c0_45, %c24] : memref<1x8x32xf32, #tpu.memory_space<vmem>>, vector<1x8x8xf32>
    %78 = vector.shape_cast %77 : vector<1x8x8xf32> to vector<8x8xf32>
    %c0_46 = arith.constant 0 : index
    %c0_47 = arith.constant 0 : index
    %c24_48 = arith.constant 24 : index
    %79 = vector.load %arg4[%c0_46, %c0_47, %c24_48] : memref<1x8x32xf32, #tpu.memory_space<vmem>>, vector<1x8x8xf32>
    %80 = vector.shape_cast %79 : vector<1x8x8xf32> to vector<8x8xf32>
    %cst_49 = arith.constant dense<0.000000e+00> : vector<8x8xf32>
    %81 = tpu.matmul %76, %78, %cst_49 {dimension_numbers = #tpu.dot_dimension_numbers<[1], [1], [0], [0], [0, 0, 1, 0], [], []>} : vector<8x8xf32>, vector<8x8xf32>, vector<8x8xf32> -> vector<8x8xf32>
    %cst_50 = arith.constant 0.353553385 : f32
    %82 = vector.broadcast %cst_50 : f32 to vector<8x8xf32>
    %83 = arith.mulf %81, %82 : vector<8x8xf32>
    %cst_51 = arith.constant dense<0xFF800000> : vector<8xf32>
    %84 = vector.multi_reduction <maximumf>, %83, %cst_51 [1] : vector<8x8xf32> to vector<8xf32>
    %85 = vector.shape_cast %84 : vector<8xf32> to vector<8x1xf32>
    %86 = vector.broadcast %85 : vector<8x1xf32> to vector<8x8xf32>
    %87 = arith.subf %83, %86 : vector<8x8xf32>
    %88 = math.exp %87 : vector<8x8xf32>
    %cst_52 = arith.constant dense<0.000000e+00> : vector<8xf32>
    %89 = vector.multi_reduction <add>, %88, %cst_52 [1] : vector<8x8xf32> to vector<8xf32>
    %90 = vector.shape_cast %89 : vector<8xf32> to vector<8x1xf32>
    %91 = tpu.reciprocal %90 {approx = true} : vector<8x1xf32> -> vector<8x1xf32>
    %92 = arith.mulf %90, %91 : vector<8x1xf32>
    %cst_53 = arith.constant 2.000000e+00 : f32
    %93 = vector.broadcast %cst_53 : f32 to vector<8x1xf32>
    %94 = arith.subf %93, %92 : vector<8x1xf32>
    %95 = arith.mulf %91, %94 : vector<8x1xf32>
    %cst_54 = arith.constant dense<0.000000e+00> : vector<8x8xf32>
    %96 = tpu.matmul %88, %80, %cst_54 {dimension_numbers = #tpu.dot_dimension_numbers<[1], [0], [0], [1], [0, 0, 1, 1], [], []>} : vector<8x8xf32>, vector<8x8xf32>, vector<8x8xf32> -> vector<8x8xf32>
    %97 = vector.broadcast %95 : vector<8x1xf32> to vector<8x8xf32>
    %98 = arith.mulf %96, %97 : vector<8x8xf32>
    %c0_55 = arith.constant 0 : index
    %c24_56 = arith.constant 24 : index
    %99 = vector.load %arg9[%c0_55, %c24_56] : memref<8x32xf32, #tpu.memory_space<vmem>>, vector<8x8xf32>
    tpu.vector_store %arg9[%c0_55, %c24_56], %98 {strides = array<i32>} : memref<8x32xf32, #tpu.memory_space<vmem>>, vector<8x8xf32>,
    %c0_57 = arith.constant 0 : index
    %c0_58 = arith.constant 0 : index
    %100 = vector.load %arg9[%c0_57, %c0_58] : memref<8x32xf32, #tpu.memory_space<vmem>>, vector<8x32xf32>
    %c0_59 = arith.constant 0 : index
    %c0_60 = arith.constant 0 : index
    %101 = vector.load %arg6[%c0_59, %c0_60] : memref<32x32xf32, #tpu.memory_space<vmem>>, vector<32x32xf32>
    %cst_61 = arith.constant dense<0.000000e+00> : vector<8x32xf32>
    %102 = tpu.matmul %100, %101, %cst_61 {dimension_numbers = #tpu.dot_dimension_numbers<[1], [0], [0], [1], [0, 0, 1, 1], [], []>} : vector<8x32xf32>, vector<32x32xf32>, vector<8x32xf32> -> vector<8x32xf32>
    %c0_62 = arith.constant 0 : index
    %c0_63 = arith.constant 0 : index
    %103 = vector.load %arg7[%c0_62, %c0_63] : memref<1x32xf32, #tpu.memory_space<vmem>>, vector<1x32xf32>
    %104 = vector.broadcast %103 : vector<1x32xf32> to vector<8x32xf32>
    %105 = arith.addf %102, %104 : vector<8x32xf32>
    %c0_64 = arith.constant 0 : index
    %c0_65 = arith.constant 0 : index
    %c0_66 = arith.constant 0 : index
    %106 = vector.load %arg8[%c0_64, %c0_65, %c0_66] : memref<1x8x32xf32, #tpu.memory_space<vmem>>, vector<1x8x32xf32>
    %107 = vector.shape_cast %106 : vector<1x8x32xf32> to vector<8x32xf32>
    %108 = vector.shape_cast %105 : vector<8x32xf32> to vector<1x8x32xf32>
    tpu.vector_store %arg8[%c0_64, %c0_65, %c0_66], %108 {strides = array<i32>} : memref<1x8x32xf32, #tpu.memory_space<vmem>>, vector<1x8x32xf32>,
    return
  }
  func.func @transform_0(%arg0: i32, %arg1: i32) -> (i32, i32, i32) {
    %c0_i32 = arith.constant 0 : i32
    %c0_i32_0 = arith.constant 0 : i32
    return %arg0, %arg1, %c0_i32 : i32, i32, i32
  }
  func.func @transform_1(%arg0: i32, %arg1: i32) -> (i32, i32, i32) {
    %c0_i32 = arith.constant 0 : i32
    %c0_i32_0 = arith.constant 0 : i32
    %c0_i32_1 = arith.constant 0 : i32
    return %arg0, %c0_i32, %c0_i32_0 : i32, i32, i32
  }
  func.func @transform_2(%arg0: i32, %arg1: i32) -> (i32, i32, i32) {
    %c0_i32 = arith.constant 0 : i32
    %c0_i32_0 = arith.constant 0 : i32
    %c0_i32_1 = arith.constant 0 : i32
    return %arg0, %c0_i32, %c0_i32_0 : i32, i32, i32
  }
  func.func @transform_3(%arg0: i32, %arg1: i32) -> (i32, i32) {
    %c0_i32 = arith.constant 0 : i32
    %c0_i32_0 = arith.constant 0 : i32
    %c0_i32_1 = arith.constant 0 : i32
    return %c0_i32, %c0_i32_0 : i32, i32
  }
  func.func @transform_4(%arg0: i32, %arg1: i32) -> (i32, i32) {
    %c0_i32 = arith.constant 0 : i32
    %c0_i32_0 = arith.constant 0 : i32
    %c0_i32_1 = arith.constant 0 : i32
    return %c0_i32, %c0_i32_0 : i32, i32
  }
  func.func @transform_5(%arg0: i32, %arg1: i32) -> (i32, i32) {
    %c0_i32 = arith.constant 0 : i32
    %c0_i32_0 = arith.constant 0 : i32
    %c0_i32_1 = arith.constant 0 : i32
    return %c0_i32, %c0_i32_0 : i32, i32
  }
  func.func @transform_6(%arg0: i32, %arg1: i32) -> (i32, i32, i32) {
    %c0_i32 = arith.constant 0 : i32
    %c0_i32_0 = arith.constant 0 : i32
    return %arg0, %arg1, %c0_i32 : i32, i32, i32
  }
}

</mosaic_0001>

<bundles_post_ra>
// kernel: tpu_custom_call.1
= control target key start
LH: loop header
LB: loop body
LE: loop exit
PB: predicated region body
PF: predicated region fallthrough
CT: control target
= control target key end

     0   :  { %s2523_s0 = inlined_call_operand.hbm [shape: f32[2,16,32], index: 0, kind: input, shape index: {}]   ;;  %s2524_s1 = inlined_call_operand.hbm [shape: f32[2,8,32], index: 1, kind: input, shape index: {}]   ;;  %s2525_s2 = inlined_call_operand.hbm [shape: f32[2,8,32], index: 2, kind: input, shape index: {}]   ;;  %s2526_s3 = inlined_call_operand.hbm [shape: f32[32,32], index: 3, kind: input, shape index: {}]   ;;  %s2527_s4 = inlined_call_operand.hbm [shape: f32[32,32], index: 4, kind: input, shape index: {}]   ;;  %s2528_s5 = inlined_call_operand.vmem [shape: f32[1,32], index: 5, kind: input, shape index: {}]   ;;  %s2529_s6 = inlined_call_operand.hbm [shape: f32[2,16,32], index: 6, kind: output, shape index: {}]  }
   0x1   :  { %2553 = sst [smem:[#allocation26_spill]] %s2524_s1 }
   0x2   :  { %2554 = sst [smem:[#allocation27_spill]] %s2526_s3 }
   0x3   :  { %2555 = sst [smem:[#allocation28_spill]] %s2527_s4 }
   0x4   :  { %2556 = sst [smem:[#allocation29_spill]] %s2528_s5 }
   0x5   :  { %2557 = sst [smem:[#allocation30_spill]] %s2529_s6 }
   0x6   :  { %11 = vsyncpa [#allocation4], 0 }
   0x7   :  { %13 = vsyncpa [#allocation4 + $0x1], 0 }
   0x8   :  { %14 = vsyncpa [#allocation7], 0 }
   0x9   :  { %16 = vsyncpa [#allocation7 + $0x1], 0 }
   0xa   :  { %17 = vsyncpa [#allocation10], 0 }
   0xb   :  { %18 = vsyncpa [#allocation5], 0 }
   0xc   :  { %20 = vsyncpa [#allocation5 + $0x1], 0  ;;  %s2048_s21 = smov 0   ;;  %s2050_s22 = smov 0  }
   0xd   :  { %s2052_s23 = smov 0   ;;  %s2054_s24 = smov 0  }
   0xe   :  { %s2056_s25 = smov 0   ;;  %s2058_s26 = smov 0  }
   0xf   :  { %s2060_s27 = smov 0   ;;  %s2062_s28 = smov 0  }
  0x10   :  { %s2064_s29 = smov 0   ;;  %s2066_s30 = smov 0  }
  0x11   :  { %s2068_s7 = smov 0  }
  0x12 LB: > { %2558 = sst [smem:[#allocation17_spill]] %s1958_s22  ;;  %s2104_s8 = sadd.s32 4294967295, %s1994_s7   ;;  %s1994_s7 = sphi %s2068_s7, %s26_s7   ;;  %s1990_s30 = sphi %s2066_s30, %s2618_s30   ;;  %s1986_s29 = sphi %s2064_s29, %s2617_s29   ;;  %s1982_s28 = sphi %s2062_s28, %s2616_s28   ;;  %s1978_s27 = sphi %s2060_s27, %s2615_s27   ;;  %s1974_s26 = sphi %s2058_s26, %s2614_s26   ;;  %s1970_s25 = sphi %s2056_s25, %s2613_s25   ;;  %s1966_s24 = sphi %s2054_s24, %s2612_s24   ;;  %s1962_s23 = sphi %s2052_s23, %s2611_s23   ;;  %s1958_s22 = sphi %s2050_s22, %s2610_s22   ;;  %s1954_s21 = sphi %s2048_s21, %s2607_s21  }
  0x13   : > { %2559 = sst [smem:[#allocation18_spill]] %s1966_s24  ;;  %p1420_p0 = scmp.ge.s32.totalorder %s1994_s7, 1 }
  0x14   : > { %2560 = sst [smem:[#allocation19_spill]] %s1978_s27  ;;  %p2530_p1 = scmp.eq.s32.totalorder %s2104_s8, 0 }
  0x15   : > { %2561 = sst [smem:[#allocation20_spill]] %s1982_s28  ;;  %p214_p2 = scmp.lt.s32.totalorder %s1994_s7, 5 }
  0x16   : > { %s1996_s10 = smov [#allocation9]   ;;  %s2564_s3 = sld [smem:[#allocation27_spill]] }
  0x17   : > { %p2109_p3 = pnand %p1420_p0, %p214_p2  ;;  %s226_s11 = sshll.u32 %s1996_s10, 4  ;;  %s227_s11 = int_to_ptr.vmem [resolvable:$true] %s226_s11 }
  0x19   : > { %s2562_s9 = scalar_select %p2109_p3, 1, 0 }
  0x1a   : > { %p1574_p4 = pneg %p2109_p3 }
  0x1c   : > { %p2117_p5 = pnand %p1574_p4, %p2530_p1  ;;  %s1718_s15 = scalar_lea.hbm %s2564_s3, 512 }
  0x1d   : > { %p1719_p6 = scmp.ne.s32.totalorder %s2564_s3, %s1718_s15  ;;  %p1725_p10 = scmp.lt.u32.totalorder %s1718_s15, %s2564_s3 }
  0x1e   : > { %p2538_p7 = pneg %p2117_p5 }
  0x20   : > { %p1721_p8 = pnand %p2538_p7, %p1719_p6 }
  0x22   : > { %p1722_p9 = pneg %p1721_p8 }
  0x24   : > { %p1727_p11 = pnand %p1725_p10, %p1722_p9 }
  0x26   : > { %1730 = shalt.err (!%p1727_p11)
}
  0x27   : > { %s1731_s20 = scalar_lea.vmem %s227_s11, 512  ;;  %p1739_p2 = scmp.lt.s32.totalorder %s227_s11, %s227_s11 }
  0x28   : > { %p1732_p12 = scmp.ne.s32.totalorder %s227_s11, %s1731_s20  ;;  %p1740_p4 = scmp.lt.s32.totalorder %s1731_s20, %s1731_s20 }
  0x2a   : > { %p1734_p13 = pnand %p1732_p12, %p2538_p7  ;;  %p1741_p1 = por %p1740_p4, %p1739_p2 }
  0x2c   : > { %p1735_p0 = pneg %p1734_p13 }
  0x2e   : > { %p1742_p3 = pnand %p1741_p1, %p1735_p0 }
  0x30   : > { %1745 = shalt.err (!%p1742_p3)
}
  0x31   : > { %s2533_s10 = smov 128   ;;  %s2535_s13 = smov 8  }
  0x32   : > { %1577 = dma.hbm_to_vmem [thread:$0]  (!%p2117_p5), %s2564_s3, 512, %s227_s11, [#allocation10], %s2533_s10, %s2533_s10, %s2535_s13  }
  0x33   : > { %p2537_p1 = scmp.eq.s32.totalorder %s1994_s7, 0  ;;  %p80_p3 = scmp.ne.s32.totalorder %s1962_s23, %s1958_s22 }
  0x34   : > { %p86_p6 = scmp.ne.s32.totalorder %s1958_s22, %s1954_s21  ;;  %p2536_p8 = scmp.lt.s32.totalorder %s1994_s7, 4 }
  0x35   : > { %p82_p9 = por %p80_p3, %p2537_p1  ;;  %s276_s16 = sand.u32 1, %s1994_s7  }
  0x36   : > { %p2565_p10 = scmp.eq.s32.totalorder %s2104_s8, 0  ;;  %s278_s18 = sand.u32 1, %s1962_s23  }
  0x37   : > { %s2534_s19 = sshll.u32 %s1990_s30, 7  ;;  %s2163_s20 = sshll.u32 %s278_s18, 3 }
  0x38   : > { %p2157_p11 = por %p86_p6, %p2565_p10  ;;  %s2568_s1 = sld [smem:[#allocation26_spill]] }
  0x39   : > { %p2174_p12 = pnand %p2536_p8, %p82_p9  ;;  %s280_s18 = scalar_lea.vmem [#allocation6], %s2163_s20 }
  0x3a   : > { %s2566_s17 = scalar_select %p2157_p11, 1, 0 }
  0x3b   : > { %s2569_s21 = scalar_select %p2174_p12, 1, 0 }
  0x3c   : > { %2567 = sst [smem:[#allocation21_spill]] %s2566_s17  ;;  %s287_s10 = sshll.u32 %s280_s18, 4  ;;  %s2180_s10 = int_to_ptr.vmem [resolvable:$true] %s287_s10 }
  0x3d   : > { %s2182_s6 = scalar_lea.sflag [#allocation7], %s276_s16  ;;  %p2540_p0 = pneg %p2174_p12 }
  0x3e   : > { %s2170_s11 = scalar_lea.hbm %s2568_s1, %s2534_s19  ;;  %s1751_s3 = scalar_lea.hbm %s2568_s1, 256 }
  0x3f   : > { %s1746_s14 = scalar_lea.hbm %s2170_s11, 128  ;;  %p1752_p3 = scmp.lt.u32.totalorder %s2170_s11, %s2568_s1 }
  0x40   : > { %p1747_p13 = scmp.ne.s32.totalorder %s2170_s11, %s1746_s14  ;;  %p1753_p6 = scmp.lt.u32.totalorder %s1751_s3, %s1746_s14 }
  0x41   : > { %p1755_p10 = scmp.lt.u32.totalorder %s1746_s14, %s2170_s11 }
  0x42   : > { %p1749_p2 = pnand %p2540_p0, %p1747_p13  ;;  %p1754_p9 = por %p1753_p6, %p1752_p3 }
  0x44   : > { %p1750_p4 = pneg %p1749_p2  ;;  %p1756_p8 = por %p1755_p10, %p1754_p9 }
  0x46   : > { %p1757_p1 = pnand %p1756_p8, %p1750_p4 }
  0x48   : > { %1760 = shalt.err (!%p1757_p1)
}
  0x49   : > { %s1761_s16 = scalar_lea.vmem %s2180_s10, 128  ;;  %s1999_s13 = smov [#allocation6]  }
  0x4a   : > { %p1762_p13 = scmp.ne.s32.totalorder %s2180_s10, %s1761_s16  ;;  %s1766_s19 = sshll.u32 %s1999_s13, 4  ;;  %s1767_s19 = int_to_ptr.vmem [resolvable:$false] %s1766_s19 }
  0x4b   : > { %s1768_s5 = scalar_lea.vmem %s1767_s19, 256  ;;  %p1769_p11 = scmp.lt.s32.totalorder %s2180_s10, %s1767_s19 }
  0x4c   : > { %p1764_p2 = pnand %p1762_p13, %p2540_p0  ;;  %p1770_p3 = scmp.lt.s32.totalorder %s1768_s5, %s1761_s16 }
  0x4e   : > { %p1765_p7 = pneg %p1764_p2  ;;  %p1771_p6 = por %p1770_p3, %p1769_p11 }
  0x50   : > { %p1772_p9 = pnand %p1771_p6, %p1765_p7 }
  0x52   : > { %1775 = shalt.err (!%p1772_p9)
}
  0x53   : > { %1587 = dma.hbm_to_vmem [thread:$0]  (!%p2174_p12), %s2170_s11, 128, %s2180_s10, %s2182_s6  }
  0x54   : > { %s2000_s3 = smov [#allocation11]   ;;  %s2570_s4 = sld [smem:[#allocation28_spill]] }
  0x55   : > { %s239_s15 = sshll.u32 %s2000_s3, 4  ;;  %p2571_p7 = pneg %p2117_p5  ;;  %s240_s15 = int_to_ptr.vmem [resolvable:$true] %s239_s15 }
  0x5a   : > { %s1776_s13 = scalar_lea.hbm %s2570_s4, 512 }
  0x5b   : > { %p1777_p1 = scmp.ne.s32.totalorder %s2570_s4, %s1776_s13  ;;  %p1783_p4 = scmp.lt.u32.totalorder %s1776_s13, %s2570_s4 }
  0x5d   : > { %p1779_p8 = pnand %p1777_p1, %p2571_p7 }
  0x5f   : > { %p1780_p11 = pneg %p1779_p8 }
  0x61   : > { %p1785_p10 = pnand %p1783_p4, %p1780_p11 }
  0x63   : > { %1788 = shalt.err (!%p1785_p10)
}
  0x64   : > { %s1789_s10 = scalar_lea.vmem %s240_s15, 512  ;;  %p2572_p2 = pmov %p2571_p7 }
  0x65   : > { %p1790_p13 = scmp.ne.s32.totalorder %s240_s15, %s1789_s10  ;;  %p1797_p9 = scmp.lt.s32.totalorder %s240_s15, %s240_s15 }
  0x66   : > { %p1798_p0 = scmp.lt.s32.totalorder %s1789_s10, %s1789_s10 }
  0x67   : > { %p1792_p3 = pnand %p1790_p13, %p2572_p2 }
  0x68   : > { %p1799_p12 = por %p1798_p0, %p1797_p9 }
  0x69   : > { %p1793_p6 = pneg %p1792_p3 }
  0x6b   : > { %p1800_p1 = pnand %p1799_p12, %p1793_p6 }
  0x6d   : > { %1803 = shalt.err (!%p1800_p1)
}
  0x6e   : > { %s2573_s1 = smov 8   ;;  %s2574_s11 = smov 128  }
  0x6f   : > { %1580 = dma.hbm_to_vmem [thread:$0]  (!%p2117_p5), %s2570_s4, 512, %s240_s15, [#allocation10], %s2574_s11, %s2574_s11, %s2573_s1  }
  0x70   : > { %s1419_s12 = sadd.s32 4294967294, %s1994_s7   ;;  %s35_s14 = sadd.s32 1, %s1986_s29 }
  0x71   : > { %p36_p12 = scmp.ge.s32.totalorder %s35_s14, 2  ;;  %s38_s13 = sadd.s32 1, %s1990_s30 }
  0x72   : > { %s47_s19 = sadd.s32 1, %s1974_s26  ;;  %p54_p0 = scmp.ne.s32.totalorder %s1974_s26, %s1970_s25 }
  0x73   : > { %s2620_s14 = smov (%p36_p12, %s35_s14), 0  ;;  %s2622_s13 = smov (!%p36_p12, %s38_s13), %s1990_s30 }
  0x74   : > { %2575 = sst [smem:[#allocation22_spill]] %s2620_s14  ;;  %s43_s16 = ssub.s32 %s1986_s29, %s2620_s14 }
  0x75   : > { %p2576_p7 = scmp.eq.s32.totalorder %s1994_s7, 0  ;;  %p40_p5 = scmp.ge.s32.totalorder %s2622_s13, 2 }
  0x76   : > { %p60_p11 = scmp.ne.s32.totalorder %s1970_s25, %s1966_s24  ;;  %p201_p4 = scmp.eq.s32.totalorder %s2104_s8, 3 }
  0x77   : > { %p2246_p8 = por %p2576_p7, %p54_p0  ;;  %p207_p10 = scmp.eq.s32.totalorder %s1419_s12, 3 }
  0x78   : > { %s2624_s13 = smov (%p40_p5, %s2622_s13), 0  ;;  %p2579_p13 = scmp.eq.s32.totalorder %s2104_s8, 0 }
  0x79   : > { %2578 = sst [smem:[#allocation23_spill]] %s2624_s13  ;;  %p2261_p3 = por %p201_p4, %p54_p0 }
  0x7a   : > { %p2257_p2 = por %p2579_p13, %p60_p11  ;;  %s42_s1 = ssub.s32 %s1990_s30, %s2624_s13 }
  0x7b   : > { %s2581_s10 = scalar_select %p2261_p3, 1, 0 }
  0x7c   : > { %p2267_p6 = por %p207_p10, %p60_p11  ;;  %s44_s3 = sor.u32 %s43_s16, %s42_s1 }
  0x7d   : > { %2582 = sst [smem:[#allocation24_spill]] %s2581_s10  ;;  %p71_p9 = scmp.eq.s32.totalorder %s42_s1, 0 }
  0x7e   : > { %s2583_s11 = scalar_select %p2267_p6, 1, 0 }
  0x7f   : > { %p45_p1 = scmp.eq.s32.totalorder %s44_s3, 0  ;;  %s256_s18 = sand.u32 1, %s1974_s26  }
  0x80   : > { %2584 = sst [smem:[#allocation25_spill]] %s2583_s11  ;;  %s2585_s12 = sadd.s32 1, %s1962_s23 }
  0x81   : > { %s2275_s4 = scalar_select %p71_p9, %s1962_s23, %s2585_s12  }
  0x82   : > { %s2278_s14 = scalar_select %p45_p1, %s1974_s26, %s47_s19  }
  0x83   : > { %s1424_s24 = sshll.u32 %s256_s18, 3  ;;  %s1425_s10 = sshll.u32 %s1990_s30, 1 }
  0x84   : > { %s265_s13 = sadd.s32 %s1986_s29, %s1425_s10  ;;  %s260_s27 = scalar_lea.vmem [#allocation3], %s1424_s24 }
  0x85   : > { %s269_s28 = sshll.u32 %s260_s27, 4  ;;  %s1426_s17 = sshll.u32 %s265_s13, 7  ;;  %s2282_s28 = int_to_ptr.vmem [resolvable:$true] %s269_s28 }
  0x86   : > { %s2287_s16 = scalar_lea.hbm %s2523_s0, %s1426_s17  ;;  %p2586_p12 = scmp.lt.s32.totalorder %s1994_s7, 4 }
  0x87   : > { %s2588_s24 = sshll.u32 %s1990_s30, 7  ;;  %s298_s22 = scalar_lea.vmem [#allocation8], %s2163_s20 }
  0x88   : > { %p2293_p0 = pnand %p2586_p12, %p2246_p8  ;;  %s2302_s10 = scalar_lea.hbm %s2525_s2, %s2588_s24 }
  0x89   : > { %s305_s17 = sshll.u32 %s298_s22, 4  ;;  %s257_s15 = scalar_lea.sflag [#allocation4], %s256_s18  ;;  %s2305_s17 = int_to_ptr.vmem [resolvable:$true] %s305_s17 }
  0x8a   : > { %s1804_s1 = scalar_lea.hbm %s2287_s16, 128  ;;  %p1806_p8 = pneg %p2293_p0 }
  0x8b   : > { %p1805_p7 = scmp.ne.s32.totalorder %s2287_s16, %s1804_s1  ;;  %s1809_s12 = scalar_lea.hbm %s2523_s0, 512 }
  0x8c   : > { %p1810_p4 = scmp.lt.u32.totalorder %s2287_s16, %s2523_s0  ;;  %p1811_p10 = scmp.lt.u32.totalorder %s1809_s12, %s1804_s1 }
  0x8d   : > { %p1807_p5 = pnand %p1806_p8, %p1805_p7  ;;  %p1813_p9 = scmp.lt.u32.totalorder %s1804_s1, %s2287_s16 }
  0x8e   : > { %p1812_p13 = por %p1811_p10, %p1810_p4 }
  0x8f   : > { %p1808_p11 = pneg %p1807_p5 }
  0x90   : > { %p1814_p1 = por %p1813_p9, %p1812_p13 }
  0x92   : > { %p1815_p12 = pnand %p1814_p1, %p1808_p11 }
  0x94   : > { %1818 = shalt.err (!%p1815_p12)
}
  0x95   : > { %s1819_s20 = scalar_lea.vmem %s2282_s28, 128  ;;  %s2001_s18 = smov [#allocation3]  }
  0x96   : > { %p1820_p7 = scmp.ne.s32.totalorder %s2282_s28, %s1819_s20  ;;  %s1824_s13 = sshll.u32 %s2001_s18, 4  ;;  %s1825_s13 = int_to_ptr.vmem [resolvable:$false] %s1824_s13 }
  0x97   : > { %s1826_s22 = scalar_lea.vmem %s1825_s13, 256  ;;  %p1827_p3 = scmp.lt.s32.totalorder %s2282_s28, %s1825_s13 }
  0x98   : > { %p1822_p5 = pnand %p1820_p7, %p1806_p8  ;;  %p1828_p4 = scmp.lt.s32.totalorder %s1826_s22, %s1819_s20 }
  0x9a   : > { %p1823_p6 = pneg %p1822_p5  ;;  %p1829_p10 = por %p1828_p4, %p1827_p3 }
  0x9c   : > { %p1830_p13 = pnand %p1829_p10, %p1823_p6 }
  0x9e   : > { %1833 = shalt.err (!%p1830_p13)
}
  0x9f   : > { %1584 = dma.hbm_to_vmem [thread:$0]  (!%p2293_p0), %s2287_s16, 128, %s2282_s28, %s257_s15  }
  0xa0   : > { %s1834_s1 = scalar_lea.hbm %s2302_s10, 128  ;;  %p2589_p11 = scmp.ne.s32.totalorder %s2569_s21, 0 }
  0xa1   : > { %p1835_p8 = scmp.ne.s32.totalorder %s2302_s10, %s1834_s1  ;;  %s1839_s12 = scalar_lea.hbm %s2525_s2, 256 }
  0xa2   : > { %p2590_p9 = pneg %p2589_p11  ;;  %p1840_p3 = scmp.lt.u32.totalorder %s2302_s10, %s2525_s2 }
  0xa3   : > { %p1841_p6 = scmp.lt.u32.totalorder %s1839_s12, %s1834_s1  ;;  %p1843_p5 = scmp.lt.u32.totalorder %s1834_s1, %s2302_s10 }
  0xa4   : > { %p1837_p1 = pnand %p1835_p8, %p2590_p9 }
  0xa5   : > { %p1842_p7 = por %p1841_p6, %p1840_p3 }
  0xa6   : > { %p1838_p12 = pneg %p1837_p1 }
  0xa7   : > { %p1844_p4 = por %p1843_p5, %p1842_p7 }
  0xa9   : > { %p1845_p10 = pnand %p1844_p4, %p1838_p12 }
  0xab   : > { %1848 = shalt.err (!%p1845_p10)
}
  0xac   : > { %s1849_s28 = scalar_lea.vmem %s2305_s17, 128  ;;  %p2591_p13 = pmov %p2590_p9 }
  0xad   : > { %p1850_p0 = scmp.ne.s32.totalorder %s2305_s17, %s1849_s28  ;;  %s2002_s16 = smov [#allocation8]  }
  0xae   : > { %s1854_s15 = sshll.u32 %s2002_s16, 4  ;;  %s1855_s15 = int_to_ptr.vmem [resolvable:$false] %s1854_s15 }
  0xaf   : > { %p1852_p8 = pnand %p1850_p0, %p2591_p13  ;;  %s1856_s24 = scalar_lea.vmem %s1855_s15, 256 }
  0xb0   : > { %p1857_p1 = scmp.lt.s32.totalorder %s2305_s17, %s1855_s15  ;;  %p1858_p3 = scmp.lt.s32.totalorder %s1856_s24, %s1849_s28 }
  0xb1   : > { %p1853_p9 = pneg %p1852_p8 }
  0xb2   : > { %p1859_p6 = por %p1858_p3, %p1857_p1 }
  0xb4   : > { %p1860_p7 = pnand %p1859_p6, %p1853_p9 }
  0xb6   : > { %1863 = shalt.err (!%p1860_p7)
}
  0xb7   : > { %1590 = dma.hbm_to_vmem [thread:$0]  (!%p2589_p11), %s2302_s10, 128, %s2305_s17, %s2182_s6  }
  0xb8   : > { %p2592_p12 = scmp.ne.s32.totalorder %s2562_s9, 0 }
  0xb9   : > { %s2359_s20 = sand.u32 (!%p2592_p12), 1, %s1970_s25  }
  0xba   : > { %314 = sbr.rel (%p2592_p12) target bundleno = 1750 (0x6d6), region = 44  ;;  %s1432_s18 = sshll.u32 (!%p2592_p12), %s2359_s20, 3 }
  0xbb   : > { %s317_s13 = scalar_lea.sflag (!%p2592_p12), [#allocation4], %s2359_s20  ;;  %s2365_s22 = scalar_lea.vmem (!%p2592_p12), [#allocation3], %s1432_s18 }
  0xc1   : > { %1937 = dma.done.wait (%p2257_p2), %s317_s13, 128  }
  0xc2   : > { %1939 = vsyncadd (%p2257_p2), %s317_s13, 4294967168  ;;  %s2593_s9 = sld [smem:[#allocation17_spill]]  ;;  %s2594_s21 = sld [smem:[#allocation21_spill]] }
  0xc3   : > { %s325_s6 = sand.u32 1, %s2104_s8  }
  0xc4   : > { %s326_s1 = scalar_lea.sflag [#allocation7], %s325_s6 }
  0xc8   : > { %s327_s10 = sand.u32 1, %s2593_s9   ;;  %p2595_p11 = scmp.ne.s32.totalorder %s2594_s21, 0 }
  0xc9   : > { %s2373_s17 = sshll.u32 %s327_s10, 3 }
  0xca   : > { %s329_s11 = scalar_lea.vmem [#allocation6], %s2373_s17 }
  0xcb   : > { %1941 = dma.done.wait (%p2595_p11), %s326_s1, 256  }
  0xcc   : > { %1943 = vsyncadd (%p2595_p11), %s326_s1, 4294967040  ;;  %s338_s3 = scalar_lea.vmem [#allocation8], %s2373_s17  ;;  %p2596_p5 = scmp.eq.s32.totalorder %s2104_s8, 0 }
  0xce   : > { %1945 = dma.done.wait (%p2596_p5), [#allocation10], 1024   ;;  %p2597_p2 = pmov %p2596_p5 }
  0xcf   : > { %v2003_v0 = vmov 0.0|0.0   ;;  %vm2004_vm0 = vmmov 0   ;;  %v2005_v1 = vmov 0.0   ;;  %vm466_vm1 = vcmask 64512   ;;  %v386_v2 = vld [vmem:[#allocation9] sm:$0xff]  ;;  %v387_v3 = vld [vmem:[#allocation9 + $0x8] sm:$0xff] }
  0xd0   : > { %1947 = vsyncadd (%p2597_p2), [#allocation10], 4294966272  ;;  %1546 = vmatprep.subr.bf16.mxu0 %v2003_v0  ;;  %1492 = vmatprep.mubr.msk.f32.mxu0 %vm2004_vm0, %v2005_v1  ;;  %v388_v4 = vld [vmem:[#allocation9 + $0x10] sm:$0xff]  ;;  %v1547_v5 = vpack.c.bf16 %v387_v3, %v386_v2  ;;  %v389_v6 = vld [vmem:[#allocation9 + $0x18] sm:$0xff]  ;;  %vm390_vm2 = vcmask 261120   ;;  %s2006_s8 = smov 120  }
  0xd1   : > { %1495 = vmatprep.subr.mxu1 %v2005_v1  ;;  %1497 = vmatprep.mubr.msk.f32.mxu1 %vm2004_vm0, %v2005_v1  ;;  %v464_v7 = vld [vmem:[%s329_s11] sm:$0xff]  ;;  %v1550_v8 = vpack.c.bf16 %v389_v6, %v388_v4  ;;  %v385_v9 = vld [vmem:[%s2365_s22] sm:$0xff]  ;;  %s2007_s5 = smov 112   ;;  %s2008_s12 = smov 104   ;;  %vm809_vm3 = vcmask 130112   ;;  %vm988_vm4 = vcmask 195712  }
  0xd2   : > { %1496 = vmatpush3.xpose.msk.msra.mxu1 %vm466_vm1, %v464_v7  ;;  %1548 = vmatpush3.bf16.msra.mxu0 %v1547_v5  ;;  %v812_v12 = vld [vmem:[%s338_s3] sm:$0xff]  ;;  %s2009_s27 = smov 8   ;;  %s2010_s19 = smov 16   ;;  %vm1167_vm5 = vcmask 261312  }
  0xd3   : > { %1500 = vmatprep.subr.mxu1 %v2005_v1  ;;  %1549 = vmatprep.subr.bf16.mxu0 %v2003_v0  ;;  %s2598_s28 = sld [smem:[#allocation20_spill]]  ;;  %s2599_s16 = sld [smem:[#allocation19_spill]] }
  0xd4   : > { %s2011_s15 = smov 24   ;;  %s2600_s24 = sld [smem:[#allocation24_spill]] }
  0xd5   : > { %s2601_s6 = sld [smem:[#allocation29_spill]]  ;;  %s384_s17 = scalar_lea.vmem [#allocation12], %s1432_s18 }
  0xd6   : > { %1551 = vmatpush3.bf16.msra.mxu0 %v1550_v8  ;;  %s1271_s1 = sshll.u32 %s384_s17, 4  ;;  %s2012_s18 = smov [#allocation12]   ;;  %s2461_s1 = int_to_ptr.vmem [resolvable:$true] %s1271_s1 }
  0xd7   : > { %1515 = vmatprep.subr.mxu0 %v2005_v1 }
  0xd9   : > { %1493 = vmatmul.mubr.msk.f32.vlgmr.msra.gmra.mrb[0].mxu0 %vm390_vm2, %v385_v9  ;;  %s1454_s13 = sshll.u32 %s2598_s28, 1 }
  0xda   : > { %1517 = vmatprep.mubr.msk.f32.mxu0 %vm2004_vm0, %v2005_v1  ;;  %s1267_s22 = sadd.s32 %s2599_s16, %s1454_s13  ;;  %p2603_p10 = scmp.ne.s32.totalorder %s2600_s24, 0 }
  0xdb   : > { %s1455_s10 = sshll.u32 %s1267_s22, 7 }
 0x1ac   : > { %v460_v10 = vpop.f32.mrb[0].mxu0 }
 0x1ad   : > { %634 = vrot.lane.b32.xlu1 %v460_v10, %s2006_s8  ;;  %v1494_v11 = vpop.f32.mrb[1].mxu0  ;;  %1498 = vmatmul.mubr.msk.f32.vlgmr.msra.gmra.mrb[0].mxu1 %vm466_vm1, %v460_v10 }
 0x1ae   : > { %1502 = vmatprep.mubr.msk.f32.mxu1 %vm2004_vm0, %v2005_v1  ;;  %1501 = vmatpush3.msra.mxu1 %v812_v12 }
 0x1af   : > { %1505 = vmatprep.subr.mxu1 %v2005_v1 }
 0x1b1   : > { %816 = vrot.lane.b32.xlu1 %v464_v7, %s2007_s5 }
 0x1b5   : > { %813 = vrot.lane.b32.xlu1 %v460_v10, %s2007_s5 }
 0x1b9   : > { %995 = vrot.lane.b32.xlu1 %v464_v7, %s2008_s12 }
 0x1bd   : > { %992 = vrot.lane.b32.xlu1 %v460_v10, %s2008_s12 }
 0x1c1   : > { %907 = vrot.lane.b32.xlu1 %v812_v12, %s2007_s5 }
 0x21f   : > { %v635_v13 = vpop.permute.xlu1 %634 }
 0x223   : > { %v817_v14 = vpop.permute.xlu1 %816 }
 0x224   : > { %1516 = vmatpush3.xpose.msk.msra.mxu0 %vm466_vm1, %v817_v14 }
 0x225   : > { %1525 = vmatprep.subr.mxu0 %v2005_v1 }
 0x227   : > { %v814_v15 = vpop.permute.xlu1 %813 }
 0x228   : > { %1518 = vmatmul.mubr.msk.f32.vlgmr.msra.gmra.mrb[2].mxu0 %vm466_vm1, %v814_v15  ;;  %v1172_v15 = vld [vmem:[#allocation11 + $0x10] sm:$0xff] }
 0x229   : > { %1527 = vmatprep.mubr.msk.f32.mxu0 %vm2004_vm0, %v2005_v1 }
 0x22b   : > { %v996_v16 = vpop.permute.xlu1 %995 }
 0x22c   : > { %1526 = vmatpush3.xpose.msk.msra.mxu0 %vm466_vm1, %v996_v16  ;;  %v1173_v16 = vld [vmem:[#allocation11 + $0x18] sm:$0xff] }
 0x22d   : > { %1552 = vmatprep.subr.bf16.mxu0 %v2003_v0 }
 0x22f   : > { %v993_v17 = vpop.permute.xlu1 %992 }
 0x230   : > { %1528 = vmatmul.mubr.msk.f32.vlgmr.msra.gmra.mrb[4].mxu0 %vm466_vm1, %v993_v17 }
 0x231   : > { %1543 = vmatprep.mubr.msk.f32.mxu0 %vm2004_vm0, %v2005_v1 }
 0x233   : > { %v908_v47 = vpop.permute.xlu1 %907 }
 0x280   : > { %v539_v18 = vpop.f32.mrb[0].mxu1 }
 0x281   : > { %v543_v19 = vmul.f32 0.35355338, %v539_v18  ;;  %v1499_v20 = vpop.f32.mrb[1].mxu1 }
 0x283   : > { %v544_v21 = vsel %vm466_vm1, %v543_v19, -inf }
 0x284   : > { %545 = vmax.xlane.f32.xlu0 %v544_v21  ;;  %v1556_v21 = vpack.c.bf16 %v1173_v16, %v1172_v15 }
 0x29a   : > { %637 = vrot.lane.b32.xlu0 %v464_v7, %s2006_s8 }
 0x2fb   : > { %v888_v22 = vpop.f32.mrb[2].mxu0 }
 0x2fc   : > { %v892_v23 = vmul.f32 0.35355338, %v888_v22  ;;  %v1519_v24 = vpop.f32.mrb[3].mxu0 }
 0x2fe   : > { %v893_v25 = vsel %vm466_vm1, %v892_v23, -inf }
 0x2ff   : > { %894 = vmax.xlane.f32.xlu0 %v893_v25 }
 0x303   : > { %v1067_v26 = vpop.f32.mrb[4].mxu0 }
 0x304   : > { %v1071_v27 = vmul.f32 0.35355338, %v1067_v26  ;;  %v1529_v28 = vpop.f32.mrb[5].mxu0 }
 0x306   : > { %v1072_v29 = vsel %vm466_vm1, %v1071_v27, -inf }
 0x307   : > { %1073 = vmax.xlane.f32.xlu1 %v1072_v29 }
 0x311   : > { %v546_v30 = vpop.xlane.xlu0 %545 }
 0x312   : > { %v547_v31 = vsub.f32 %v543_v19, %v546_v30 }
 0x314   : > { %v548_v32 = vmul.f32 1.442695, %v547_v31 }
 0x315   : > { %728 = vrot.lane.b32.xlu0 %v812_v12, %s2006_s8  ;;  %v638_v33 = vpop.permute.xlu0 %637  ;;  %s2602_s8 = sld [smem:[#allocation30_spill]] }
 0x316   : > { %1702 = vpow2.f32 %v548_v32 }
 0x31b   : > { %s2459_s5 = scalar_lea.hbm %s2602_s8, %s1455_s10 }
 0x320   : > { %v1703_v34 = vpop.eup %1702 }
 0x321   : > { %1503 = vmatmul.mubr.msk.f32.vlgmr.msra.gmra.mrb[2].mxu1 %vm466_vm1, %v1703_v34  ;;  %v550_v59 = vsel %vm466_vm1, %v1703_v34, 0.0 }
 0x322   : > { %1506 = vmatpush3.xpose.msk.msra.mxu1 %vm466_vm1, %v638_v33  ;;  %1507 = vmatprep.mubr.msk.f32.mxu1 %vm2004_vm0, %v2005_v1 }
 0x323   : > { %1510 = vmatprep.subr.mxu1 %v2005_v1 }
 0x325   : > { %1508 = vmatmul.mubr.msk.f32.vlgmr.msra.gmra.mrb[4].mxu1 %vm466_vm1, %v635_v13  ;;  %v1171_v13 = vld [vmem:[#allocation11 + $0x8] sm:$0xff] }
 0x326   : > { %1512 = vmatprep.mubr.msk.f32.mxu1 %vm2004_vm0, %v2005_v1 }
 0x38c   : > { %v895_v41 = vpop.xlane.xlu0 %894 }
 0x38d   : > { %v896_v43 = vsub.f32 %v892_v23, %v895_v41 }
 0x38f   : > { %v897_v44 = vmul.f32 1.442695, %v896_v43 }
 0x390   : > { %v729_v42 = vpop.permute.xlu0 %728 }
 0x391   : > { %1511 = vmatpush3.msra.mxu1 %v729_v42  ;;  %1704 = vpow2.f32 %v897_v44 }
 0x392   : > { %1520 = vmatprep.subr.mxu1 %v2005_v1 }
 0x394   : > { %v1074_v48 = vpop.xlane.xlu1 %1073 }
 0x395   : > { %v1075_v49 = vsub.f32 %v1071_v27, %v1074_v48 }
 0x397   : > { %v1076_v52 = vmul.f32 1.442695, %v1075_v49 }
 0x39b   : > { %v1705_v45 = vpop.eup %1704 }
 0x39c   : > { %v899_v46 = vsel %vm466_vm1, %v1705_v45, 0.0 }
 0x3f4   : > { %v626_v35 = vpop.f32.mrb[2].mxu1 }
 0x3f5   : > { %v1504_v36 = vpop.f32.mrb[3].mxu1 }
 0x3f6   : > { %v1451_v36 = vld [vmem:[%s2601_s6] ss:$0 sm:$0xff] }
 0x3f8   : > { %v709_v37 = vpop.f32.mrb[4].mxu1 }
 0x3f9   : > { %v713_v38 = vmul.f32 0.35355338, %v709_v37  ;;  %v1509_v39 = vpop.f32.mrb[5].mxu1 }
 0x3fb   : > { %v714_v40 = vsel %vm466_vm1, %v713_v38, -inf }
 0x3fc   : > { %715 = vmax.xlane.f32.xlu1 %v714_v40 }
 0x40d   : > { %1086 = vrot.lane.b32.xlu1 %v812_v12, %s2008_s12  ;;  %v1170_v12 = vld [vmem:[#allocation11] sm:$0xff]  ;;  %s1256_s12 = scalar_lea.sflag [#allocation5], %s2359_s20 }
 0x40e   : > { %v1553_v14 = vpack.c.bf16 %v1171_v13, %v1170_v12 }
 0x410   : > { %1554 = vmatpush3.bf16.msra.mxu0 %v1553_v14 }
 0x411   : > { %1555 = vmatprep.subr.bf16.mxu0 %v2003_v0 }
 0x414   : > { %1557 = vmatpush3.bf16.msra.mxu0 %v1556_v21 }
 0x431   : > { %900 = vadd.xlane.f32.xlu1 %v899_v46 }
 0x489   : > { %v716_v50 = vpop.xlane.xlu1 %715 }
 0x48a   : > { %v717_v51 = vsub.f32 %v713_v38, %v716_v50 }
 0x48c   : > { %v718_v53 = vmul.f32 1.442695, %v717_v51 }
 0x48d   : > { %v1087_v57 = vpop.permute.xlu1 %1086 }
 0x48e   : > { %1706 = vpow2.f32 %v718_v53 }
 0x48f   : > { %1708 = vpow2.f32 %v1076_v52 }
 0x498   : > { %v1707_v54 = vpop.eup %1706 }
 0x499   : > { %1513 = vmatmul.mubr.msk.f32.vlgmr.msra.gmra.mrb[6].mxu1 %vm466_vm1, %v1707_v54  ;;  %v720_v55 = vsel %vm466_vm1, %v1707_v54, 0.0  ;;  %v1709_v56 = vpop.eup %1708 }
 0x49a   : > { %1521 = vmatpush3.msra.mxu1 %v908_v47  ;;  %721 = vadd.xlane.f32.xlu0 %v720_v55  ;;  %v1078_v58 = vsel %vm466_vm1, %v1709_v56, 0.0 }
 0x49b   : > { %1522 = vmatprep.mubr.msk.f32.mxu1 %vm2004_vm0, %v2005_v1  ;;  %1530 = vmatprep.subr.mxu1 %v2005_v1 }
 0x49d   : > { %1523 = vmatmul.mubr.msk.f32.vlgmr.msra.gmra.mrb[8].mxu1 %vm466_vm1, %v1705_v45 }
 0x49e   : > { %1531 = vmatpush3.msra.mxu1 %v1087_v57  ;;  %1079 = vadd.xlane.f32.xlu0 %v1078_v58 }
 0x49f   : > { %1532 = vmatprep.mubr.msk.f32.mxu1 %vm2004_vm0, %v2005_v1 }
 0x4a1   : > { %1533 = vmatmul.mubr.msk.f32.vlgmr.msra.gmra.mrb[10].mxu1 %vm466_vm1, %v1709_v56 }
 0x4a2   : > { %551 = vadd.xlane.f32.xlu0 %v550_v59 }
 0x4be   : > { %v901_v6 = vpop.xlane.xlu1 %900 }
 0x527   : > { %v722_v60 = vpop.xlane.xlu0 %721 }
 0x52b   : > { %v1080_v61 = vpop.xlane.xlu0 %1079 }
 0x52f   : > { %v552_v62 = vpop.xlane.xlu0 %551 }
 0x530   : > { %1710 = vrcp.f32 %v552_v62 }
 0x531   : > { %1712 = vrcp.f32 %v722_v60 }
 0x532   : > { %1714 = vrcp.f32 %v901_v6 }
 0x533   : > { %1716 = vrcp.f32 %v1080_v61 }
 0x53a   : > { %v1711_v63 = vpop.eup %1710 }
 0x53b   : > { %v554_v2 = vmul.f32 %v1711_v63, %v552_v62  ;;  %v1713_v1 = vpop.eup %1712 }
 0x53c   : > { %v724_v7 = vmul.f32 %v1713_v1, %v722_v60  ;;  %v1715_v8 = vpop.eup %1714 }
 0x53d   : > { %v555_v3 = vsub.f32 2.0, %v554_v2  ;;  %v903_v9 = vmul.f32 %v1715_v8, %v901_v6  ;;  %v1717_v11 = vpop.eup %1716 }
 0x53e   : > { %v725_v10 = vsub.f32 2.0, %v724_v7  ;;  %v1082_v18 = vmul.f32 %v1717_v11, %v1080_v61 }
 0x53f   : > { %v556_v4 = vmul.f32 %v1711_v63, %v555_v3  ;;  %v904_v17 = vsub.f32 2.0, %v903_v9 }
 0x540   : > { %v726_v19 = vmul.f32 %v1713_v1, %v725_v10  ;;  %v1083_v24 = vsub.f32 2.0, %v1082_v18 }
 0x541   : > { %v630_v5 = vmul.f32 %v626_v35, %v556_v4  ;;  %v905_v25 = vmul.f32 %v1715_v8, %v904_v17 }
 0x542   : > { %v1084_v29 = vmul.f32 %v1717_v11, %v1083_v24 }
 0x543   : > { %631 = vst.msk [vmem:[#allocation2] sm:$0xff] %vm466_vm1, %v630_v5 }
 0x56c   : > { %v800_v20 = vpop.f32.mrb[6].mxu1 }
 0x56d   : > { %v804_v22 = vmul.f32 %v800_v20, %v726_v19  ;;  %v1514_v23 = vpop.f32.mrb[7].mxu1 }
 0x56f   : > { %806 = vrot.lane.b32.xlu1 %v804_v22, %s2009_s27  ;;  %s1864_s27 = scalar_lea.vmem %s2461_s1, 128 }
 0x570   : > { %v979_v26 = vpop.f32.mrb[8].mxu1  ;;  %p1865_p4 = scmp.ne.s32.totalorder %s2461_s1, %s1864_s27 }
 0x571   : > { %v983_v27 = vmul.f32 %v979_v26, %v905_v25  ;;  %v1524_v28 = vpop.f32.mrb[9].mxu1 }
 0x572   : > { %p1866_p0 = pnand %p1865_p4, %p2603_p10 }
 0x573   : > { %985 = vrot.lane.b32.xlu0 %v983_v27, %s2010_s19  ;;  %s1868_s19 = sshll.u32 %s2012_s18, 4  ;;  %s1869_s19 = int_to_ptr.vmem [resolvable:$false] %s1868_s19 }
 0x574   : > { %v1158_v30 = vpop.f32.mrb[10].mxu1  ;;  %p1867_p13 = pneg %p1866_p0  ;;  %s1870_s28 = scalar_lea.vmem %s1869_s19, 256 }
 0x575   : > { %v1162_v31 = vmul.f32 %v1158_v30, %v1084_v29  ;;  %v1534_v32 = vpop.f32.mrb[11].mxu1  ;;  %p1871_p8 = scmp.lt.s32.totalorder %s2461_s1, %s1869_s19  ;;  %p1872_p9 = scmp.lt.s32.totalorder %s1870_s28, %s1864_s27 }
 0x577   : > { %1164 = vrot.lane.b32.xlu1 %v1162_v31, %s2011_s15  ;;  %p1873_p1 = por %p1872_p9, %p1871_p8 }
 0x579   : > { %p1874_p3 = pnand %p1873_p1, %p1867_p13 }
 0x5e1   : > { %v807_v0 = vpop.permute.xlu1 %806 }
 0x5e2   : > { %810 = vst.msk [vmem:[#allocation2] sm:$0xff] %vm809_vm3, %v807_v0 }
 0x5e5   : > { %v986_v33 = vpop.permute.xlu0 %985 }
 0x5e6   : > { %989 = vst.msk [vmem:[#allocation2] sm:$0xff] %vm988_vm4, %v986_v33 }
 0x5e9   : > { %v1165_v34 = vpop.permute.xlu1 %1164 }
 0x5ea   : > { %1168 = vst.msk [vmem:[#allocation2] sm:$0xff] %vm1167_vm5, %v1165_v34 }
 0x5f1   : > { %v1169_v35 = vld [vmem:[#allocation2] sm:$0xff] }
 0x5f2   : > { %1544 = vmatmul.mubr.msk.f32.vlgmr.msra.gmra.mrb[6].mxu0 %vm390_vm2, %v1169_v35 }
 0x6c5   : > { %v1250_v37 = vpop.f32.mrb[6].mxu0 }
 0x6c6   : > { %v1251_v38 = vadd.f32 %v1451_v36, %v1250_v37  ;;  %v1545_v39 = vpop.f32.mrb[7].mxu0 }
 0x6c8   : > { %1254 = vst.msk [vmem:[%s384_s17] sm:$0xff] %vm390_vm2, %v1251_v38 }
 0x6c9   : > { %1877 = shalt.err (!%p1874_p3)
}
 0x6ca   : > { %s1878_s20 = scalar_lea.hbm %s2459_s5, 128  ;;  %s1882_s13 = scalar_lea.hbm %s2602_s8, 512 }
 0x6cb   : > { %p1879_p6 = scmp.ne.s32.totalorder %s2459_s5, %s1878_s20  ;;  %p1883_p11 = scmp.lt.u32.totalorder %s2459_s5, %s2602_s8 }
 0x6cc   : > { %p1884_p5 = scmp.lt.u32.totalorder %s1882_s13, %s1878_s20  ;;  %p1886_p4 = scmp.lt.u32.totalorder %s1878_s20, %s2459_s5 }
 0x6cd   : > { %p1880_p7 = pnand %p1879_p6, %p2603_p10 }
 0x6ce   : > { %p1885_p2 = por %p1884_p5, %p1883_p11 }
 0x6cf   : > { %p1881_p12 = pneg %p1880_p7 }
 0x6d0   : > { %p1887_p0 = por %p1886_p4, %p1885_p2 }
 0x6d2   : > { %p1888_p13 = pnand %p1887_p0, %p1881_p12 }
 0x6d4   : > { %1891 = shalt.err (!%p1888_p13)
}
 0x6d5   : > { %1572 = dma.vmem_to_hbm [thread:$0]  (%p2603_p10), %s2461_s1, 128, %s2459_s5, %s1256_s12  }
 0x6d6 PF: > { %s2604_s21 = sld [smem:[#allocation18_spill]]  ;;  %s2605_s6 = sld [smem:[#allocation25_spill]] }
 0x6d7   : > { %p1600_p8 = scmp.ge.s32.totalorder %s1994_s7, 2 }
 0x6dc   : > { %s1283_s10 = sand.u32 1, %s2604_s21   ;;  %p2606_p9 = scmp.ne.s32.totalorder %s2605_s6, 0 }
 0x6dd   : > { %s1284_s17 = scalar_lea.sflag [#allocation5], %s1283_s10 }
 0x6de   : > { %p1592_p1 = pnand %p1600_p8, %p2606_p9 }
 0x6e0   : > { %1949 = dma.done.wait (!%p1592_p1), %s1284_s17, 128  }
 0x6e1   : > { %1951 = vsyncadd (!%p1592_p1), %s1284_s17, 4294967168  ;;  %s26_s7 = sadd.s32 1, %s1994_s7   ;;  %s2607_s21 = sld [smem:[#allocation17_spill]] }
 0x6e2   : > { %p23_p3 = scmp.ge.s32.totalorder %s26_s7, 6   ;;  %s2608_s1 = sld [smem:[#allocation22_spill]] }
 0x6e3   : > { %s2609_s11 = sld [smem:[#allocation23_spill]]  ;;  %s2610_s22 = smov %s1962_s23 }
 0x6e4   : > { %s2611_s23 = smov %s2275_s4  ;;  %s2612_s24 = smov %s1970_s25 }
 0x6e5   : > { %s2613_s25 = smov %s1974_s26  ;;  %s2614_s26 = smov %s2278_s14 }
 0x6e6   : > { %s2615_s27 = smov %s1986_s29  ;;  %s2616_s28 = smov %s1990_s30 }
 0x6e7   :  { %25 = sbr.rel (!%p23_p3) target bundleno = 18 (0x12), region = 121 }
 0x6e8   : > { %s2617_s29 = smov %s2608_s1 }
 0x6e9   : > { %s2618_s30 = smov %s2609_s11 }
 0x6ee   :  { %1289 = vsyncpa [#allocation4], 1 }
 0x6ef   :  { %1291 = vsyncpa [#allocation4 + $0x1], 1 }
 0x6f0   :  { %1292 = vsyncpa [#allocation7], 1 }
 0x6f1   :  { %1294 = vsyncpa [#allocation7 + $0x1], 1 }
 0x6f2   :  { %1295 = vsyncpa [#allocation10], 1 }
 0x6f3   :  { %1296 = vsyncpa [#allocation5], 1 }
 0x6f4   :  { %1298 = vsyncpa [#allocation5 + $0x1], 1 }

// kernel: tpu_custom_call.1
= control target key start
LH: loop header
LB: loop body
LE: loop exit
PB: predicated region body
PF: predicated region fallthrough
CT: control target
= control target key end

     0   :  { %s2523_s0 = inlined_call_operand.hbm [shape: f32[2,16,32], index: 0, kind: input, shape index: {}]   ;;  %s2524_s1 = inlined_call_operand.hbm [shape: f32[2,8,32], index: 1, kind: input, shape index: {}]   ;;  %s2525_s2 = inlined_call_operand.hbm [shape: f32[2,8,32], index: 2, kind: input, shape index: {}]   ;;  %s2526_s3 = inlined_call_operand.hbm [shape: f32[32,32], index: 3, kind: input, shape index: {}]   ;;  %s2527_s4 = inlined_call_operand.hbm [shape: f32[32,32], index: 4, kind: input, shape index: {}]   ;;  %s2528_s5 = inlined_call_operand.vmem [shape: f32[1,32], index: 5, kind: input, shape index: {}]   ;;  %s2529_s6 = inlined_call_operand.hbm [shape: f32[2,16,32], index: 6, kind: output, shape index: {}]  }
   0x1   :  { %2553 = sst [smem:[#allocation26_spill]] %s2524_s1 }
   0x2   :  { %2554 = sst [smem:[#allocation27_spill]] %s2526_s3 }
   0x3   :  { %2555 = sst [smem:[#allocation28_spill]] %s2527_s4 }
   0x4   :  { %2556 = sst [smem:[#allocation29_spill]] %s2528_s5 }
   0x5   :  { %2557 = sst [smem:[#allocation30_spill]] %s2529_s6 }
   0x6   :  { %11 = vsyncpa [#allocation4], 0 }
   0x7   :  { %13 = vsyncpa [#allocation4 + $0x1], 0 }
   0x8   :  { %14 = vsyncpa [#allocation7], 0 }
   0x9   :  { %16 = vsyncpa [#allocation7 + $0x1], 0 }
   0xa   :  { %17 = vsyncpa [#allocation10], 0 }
   0xb   :  { %18 = vsyncpa [#allocation5], 0 }
   0xc   :  { %20 = vsyncpa [#allocation5 + $0x1], 0  ;;  %s2048_s21 = smov 0   ;;  %s2050_s22 = smov 0  }
   0xd   :  { %s2052_s23 = smov 0   ;;  %s2054_s24 = smov 0  }
   0xe   :  { %s2056_s25 = smov 0   ;;  %s2058_s26 = smov 0  }
   0xf   :  { %s2060_s27 = smov 0   ;;  %s2062_s28 = smov 0  }
  0x10   :  { %s2064_s29 = smov 0   ;;  %s2066_s30 = smov 0  }
  0x11   :  { %s2068_s7 = smov 0  }
  0x12 LB: > { %2558 = sst [smem:[#allocation17_spill]] %s1958_s22  ;;  %s2104_s8 = sadd.s32 4294967295, %s1994_s7   ;;  %s1994_s7 = sphi %s2068_s7, %s26_s7   ;;  %s1990_s30 = sphi %s2066_s30, %s2618_s30   ;;  %s1986_s29 = sphi %s2064_s29, %s2617_s29   ;;  %s1982_s28 = sphi %s2062_s28, %s2616_s28   ;;  %s1978_s27 = sphi %s2060_s27, %s2615_s27   ;;  %s1974_s26 = sphi %s2058_s26, %s2614_s26   ;;  %s1970_s25 = sphi %s2056_s25, %s2613_s25   ;;  %s1966_s24 = sphi %s2054_s24, %s2612_s24   ;;  %s1962_s23 = sphi %s2052_s23, %s2611_s23   ;;  %s1958_s22 = sphi %s2050_s22, %s2610_s22   ;;  %s1954_s21 = sphi %s2048_s21, %s2607_s21  }
  0x13   : > { %2559 = sst [smem:[#allocation18_spill]] %s1966_s24  ;;  %p1420_p0 = scmp.ge.s32.totalorder %s1994_s7, 1 }
  0x14   : > { %2560 = sst [smem:[#allocation19_spill]] %s1978_s27  ;;  %p2530_p1 = scmp.eq.s32.totalorder %s2104_s8, 0 }
  0x15   : > { %2561 = sst [smem:[#allocation20_spill]] %s1982_s28  ;;  %p214_p2 = scmp.lt.s32.totalorder %s1994_s7, 5 }
  0x16   : > { %s1996_s10 = smov [#allocation9]   ;;  %s2564_s3 = sld [smem:[#allocation27_spill]] }
  0x17   : > { %p2109_p3 = pnand %p1420_p0, %p214_p2  ;;  %s226_s11 = sshll.u32 %s1996_s10, 4  ;;  %s227_s11 = int_to_ptr.vmem [resolvable:$true] %s226_s11 }
  0x19   : > { %s2562_s9 = scalar_select %p2109_p3, 1, 0 }
  0x1a   : > { %p1574_p4 = pneg %p2109_p3 }
  0x1c   : > { %p2117_p5 = pnand %p1574_p4, %p2530_p1  ;;  %s1718_s15 = scalar_lea.hbm %s2564_s3, 512 }
  0x1d   : > { %p1719_p6 = scmp.ne.s32.totalorder %s2564_s3, %s1718_s15  ;;  %p1725_p10 = scmp.lt.u32.totalorder %s1718_s15, %s2564_s3 }
  0x1e   : > { %p2538_p7 = pneg %p2117_p5 }
  0x20   : > { %p1721_p8 = pnand %p2538_p7, %p1719_p6 }
  0x22   : > { %p1722_p9 = pneg %p1721_p8 }
  0x24   : > { %p1727_p11 = pnand %p1725_p10, %p1722_p9 }
  0x26   : > { %1730 = shalt.err (!%p1727_p11)
}
  0x27   : > { %s1731_s20 = scalar_lea.vmem %s227_s11, 512  ;;  %p1739_p2 = scmp.lt.s32.totalorder %s227_s11, %s227_s11 }
  0x28   : > { %p1732_p12 = scmp.ne.s32.totalorder %s227_s11, %s1731_s20  ;;  %p1740_p4 = scmp.lt.s32.totalorder %s1731_s20, %s1731_s20 }
  0x2a   : > { %p1734_p13 = pnand %p1732_p12, %p2538_p7  ;;  %p1741_p1 = por %p1740_p4, %p1739_p2 }
  0x2c   : > { %p1735_p0 = pneg %p1734_p13 }
  0x2e   : > { %p1742_p3 = pnand %p1741_p1, %p1735_p0 }
  0x30   : > { %1745 = shalt.err (!%p1742_p3)
}
  0x31   : > { %s2533_s10 = smov 128   ;;  %s2535_s13 = smov 8  }
  0x32   : > { %1577 = dma.hbm_to_vmem [thread:$0]  (!%p2117_p5), %s2564_s3, 512, %s227_s11, [#allocation10], %s2533_s10, %s2533_s10, %s2535_s13  }
  0x33   : > { %p2537_p1 = scmp.eq.s32.totalorder %s1994_s7, 0  ;;  %p80_p3 = scmp.ne.s32.totalorder %s1962_s23, %s1958_s22 }
  0x34   : > { %p86_p6 = scmp.ne.s32.totalorder %s1958_s22, %s1954_s21  ;;  %p2536_p8 = scmp.lt.s32.totalorder %s1994_s7, 4 }
  0x35   : > { %p82_p9 = por %p80_p3, %p2537_p1  ;;  %s276_s16 = sand.u32 1, %s1994_s7  }
  0x36   : > { %p2565_p10 = scmp.eq.s32.totalorder %s2104_s8, 0  ;;  %s278_s18 = sand.u32 1, %s1962_s23  }
  0x37   : > { %s2534_s19 = sshll.u32 %s1990_s30, 7  ;;  %s2163_s20 = sshll.u32 %s278_s18, 3 }
  0x38   : > { %p2157_p11 = por %p86_p6, %p2565_p10  ;;  %s2568_s1 = sld [smem:[#allocation26_spill]] }
  0x39   : > { %p2174_p12 = pnand %p2536_p8, %p82_p9  ;;  %s280_s18 = scalar_lea.vmem [#allocation6], %s2163_s20 }
  0x3a   : > { %s2566_s17 = scalar_select %p2157_p11, 1, 0 }
  0x3b   : > { %s2569_s21 = scalar_select %p2174_p12, 1, 0 }
  0x3c   : > { %2567 = sst [smem:[#allocation21_spill]] %s2566_s17  ;;  %s287_s10 = sshll.u32 %s280_s18, 4  ;;  %s2180_s10 = int_to_ptr.vmem [resolvable:$true] %s287_s10 }
  0x3d   : > { %s2182_s6 = scalar_lea.sflag [#allocation7], %s276_s16  ;;  %p2540_p0 = pneg %p2174_p12 }
  0x3e   : > { %s2170_s11 = scalar_lea.hbm %s2568_s1, %s2534_s19  ;;  %s1751_s3 = scalar_lea.hbm %s2568_s1, 256 }
  0x3f   : > { %s1746_s14 = scalar_lea.hbm %s2170_s11, 128  ;;  %p1752_p3 = scmp.lt.u32.totalorder %s2170_s11, %s2568_s1 }
  0x40   : > { %p1747_p13 = scmp.ne.s32.totalorder %s2170_s11, %s1746_s14  ;;  %p1753_p6 = scmp.lt.u32.totalorder %s1751_s3, %s1746_s14 }
  0x41   : > { %p1755_p10 = scmp.lt.u32.totalorder %s1746_s14, %s2170_s11 }
  0x42   : > { %p1749_p2 = pnand %p2540_p0, %p1747_p13  ;;  %p1754_p9 = por %p1753_p6, %p1752_p3 }
  0x44   : > { %p1750_p4 = pneg %p1749_p2  ;;  %p1756_p8 = por %p1755_p10, %p1754_p9 }
  0x46   : > { %p1757_p1 = pnand %p1756_p8, %p1750_p4 }
  0x48   : > { %1760 = shalt.err (!%p1757_p1)
}
  0x49   : > { %s1761_s16 = scalar_lea.vmem %s2180_s10, 128  ;;  %s1999_s13 = smov [#allocation6]  }
  0x4a   : > { %p1762_p13 = scmp.ne.s32.totalorder %s2180_s10, %s1761_s16  ;;  %s1766_s19 = sshll.u32 %s1999_s13, 4  ;;  %s1767_s19 = int_to_ptr.vmem [resolvable:$false] %s1766_s19 }
  0x4b   : > { %s1768_s5 = scalar_lea.vmem %s1767_s19, 256  ;;  %p1769_p11 = scmp.lt.s32.totalorder %s2180_s10, %s1767_s19 }
  0x4c   : > { %p1764_p2 = pnand %p1762_p13, %p2540_p0  ;;  %p1770_p3 = scmp.lt.s32.totalorder %s1768_s5, %s1761_s16 }
  0x4e   : > { %p1765_p7 = pneg %p1764_p2  ;;  %p1771_p6 = por %p1770_p3, %p1769_p11 }
  0x50   : > { %p1772_p9 = pnand %p1771_p6, %p1765_p7 }
  0x52   : > { %1775 = shalt.err (!%p1772_p9)
}
  0x53   : > { %1587 = dma.hbm_to_vmem [thread:$0]  (!%p2174_p12), %s2170_s11, 128, %s2180_s10, %s2182_s6  }
  0x54   : > { %s2000_s3 = smov [#allocation11]   ;;  %s2570_s4 = sld [smem:[#allocation28_spill]] }
  0x55   : > { %s239_s15 = sshll.u32 %s2000_s3, 4  ;;  %p2571_p7 = pneg %p2117_p5  ;;  %s240_s15 = int_to_ptr.vmem [resolvable:$true] %s239_s15 }
  0x5a   : > { %s1776_s13 = scalar_lea.hbm %s2570_s4, 512 }
  0x5b   : > { %p1777_p1 = scmp.ne.s32.totalorder %s2570_s4, %s1776_s13  ;;  %p1783_p4 = scmp.lt.u32.totalorder %s1776_s13, %s2570_s4 }
  0x5d   : > { %p1779_p8 = pnand %p1777_p1, %p2571_p7 }
  0x5f   : > { %p1780_p11 = pneg %p1779_p8 }
  0x61   : > { %p1785_p10 = pnand %p1783_p4, %p1780_p11 }
  0x63   : > { %1788 = shalt.err (!%p1785_p10)
}
  0x64   : > { %s1789_s10 = scalar_lea.vmem %s240_s15, 512  ;;  %p2572_p2 = pmov %p2571_p7 }
  0x65   : > { %p1790_p13 = scmp.ne.s32.totalorder %s240_s15, %s1789_s10  ;;  %p1797_p9 = scmp.lt.s32.totalorder %s240_s15, %s240_s15 }
  0x66   : > { %p1798_p0 = scmp.lt.s32.totalorder %s1789_s10, %s1789_s10 }
  0x67   : > { %p1792_p3 = pnand %p1790_p13, %p2572_p2 }
  0x68   : > { %p1799_p12 = por %p1798_p0, %p1797_p9 }
  0x69   : > { %p1793_p6 = pneg %p1792_p3 }
  0x6b   : > { %p1800_p1 = pnand %p1799_p12, %p1793_p6 }
  0x6d   : > { %1803 = shalt.err (!%p1800_p1)
}
  0x6e   : > { %s2573_s1 = smov 8   ;;  %s2574_s11 = smov 128  }
  0x6f   : > { %1580 = dma.hbm_to_vmem [thread:$0]  (!%p2117_p5), %s2570_s4, 512, %s240_s15, [#allocation10], %s2574_s11, %s2574_s11, %s2573_s1  }
  0x70   : > { %s1419_s12 = sadd.s32 4294967294, %s1994_s7   ;;  %s35_s14 = sadd.s32 1, %s1986_s29 }
  0x71   : > { %p36_p12 = scmp.ge.s32.totalorder %s35_s14, 2  ;;  %s38_s13 = sadd.s32 1, %s1990_s30 }
  0x72   : > { %s47_s19 = sadd.s32 1, %s1974_s26  ;;  %p54_p0 = scmp.ne.s32.totalorder %s1974_s26, %s1970_s25 }
  0x73   : > { %s2620_s14 = smov (%p36_p12, %s35_s14), 0  ;;  %s2622_s13 = smov (!%p36_p12, %s38_s13), %s1990_s30 }
  0x74   : > { %2575 = sst [smem:[#allocation22_spill]] %s2620_s14  ;;  %s43_s16 = ssub.s32 %s1986_s29, %s2620_s14 }
  0x75   : > { %p2576_p7 = scmp.eq.s32.totalorder %s1994_s7, 0  ;;  %p40_p5 = scmp.ge.s32.totalorder %s2622_s13, 2 }
  0x76   : > { %p60_p11 = scmp.ne.s32.totalorder %s1970_s25, %s1966_s24  ;;  %p201_p4 = scmp.eq.s32.totalorder %s2104_s8, 3 }
  0x77   : > { %p2246_p8 = por %p2576_p7, %p54_p0  ;;  %p207_p10 = scmp.eq.s32.totalorder %s1419_s12, 3 }
  0x78   : > { %s2624_s13 = smov (%p40_p5, %s2622_s13), 0  ;;  %p2579_p13 = scmp.eq.s32.totalorder %s2104_s8, 0 }
  0x79   : > { %2578 = sst [smem:[#allocation23_spill]] %s2624_s13  ;;  %p2261_p3 = por %p201_p4, %p54_p0 }
  0x7a   : > { %p2257_p2 = por %p2579_p13, %p60_p11  ;;  %s42_s1 = ssub.s32 %s1990_s30, %s2624_s13 }
  0x7b   : > { %s2581_s10 = scalar_select %p2261_p3, 1, 0 }
  0x7c   : > { %p2267_p6 = por %p207_p10, %p60_p11  ;;  %s44_s3 = sor.u32 %s43_s16, %s42_s1 }
  0x7d   : > { %2582 = sst [smem:[#allocation24_spill]] %s2581_s10  ;;  %p71_p9 = scmp.eq.s32.totalorder %s42_s1, 0 }
  0x7e   : > { %s2583_s11 = scalar_select %p2267_p6, 1, 0 }
  0x7f   : > { %p45_p1 = scmp.eq.s32.totalorder %s44_s3, 0  ;;  %s256_s18 = sand.u32 1, %s1974_s26  }
  0x80   : > { %2584 = sst [smem:[#allocation25_spill]] %s2583_s11  ;;  %s2585_s12 = sadd.s32 1, %s1962_s23 }
  0x81   : > { %s2275_s4 = scalar_select %p71_p9, %s1962_s23, %s2585_s12  }
  0x82   : > { %s2278_s14 = scalar_select %p45_p1, %s1974_s26, %s47_s19  }
  0x83   : > { %s1424_s24 = sshll.u32 %s256_s18, 3  ;;  %s1425_s10 = sshll.u32 %s1990_s30, 1 }
  0x84   : > { %s265_s13 = sadd.s32 %s1986_s29, %s1425_s10  ;;  %s260_s27 = scalar_lea.vmem [#allocation3], %s1424_s24 }
  0x85   : > { %s269_s28 = sshll.u32 %s260_s27, 4  ;;  %s1426_s17 = sshll.u32 %s265_s13, 7  ;;  %s2282_s28 = int_to_ptr.vmem [resolvable:$true] %s269_s28 }
  0x86   : > { %s2287_s16 = scalar_lea.hbm %s2523_s0, %s1426_s17  ;;  %p2586_p12 = scmp.lt.s32.totalorder %s1994_s7, 4 }
  0x87   : > { %s2588_s24 = sshll.u32 %s1990_s30, 7  ;;  %s298_s22 = scalar_lea.vmem [#allocation8], %s2163_s20 }
  0x88   : > { %p2293_p0 = pnand %p2586_p12, %p2246_p8  ;;  %s2302_s10 = scalar_lea.hbm %s2525_s2, %s2588_s24 }
  0x89   : > { %s305_s17 = sshll.u32 %s298_s22, 4  ;;  %s257_s15 = scalar_lea.sflag [#allocation4], %s256_s18  ;;  %s2305_s17 = int_to_ptr.vmem [resolvable:$true] %s305_s17 }
  0x8a   : > { %s1804_s1 = scalar_lea.hbm %s2287_s16, 128  ;;  %p1806_p8 = pneg %p2293_p0 }
  0x8b   : > { %p1805_p7 = scmp.ne.s32.totalorder %s2287_s16, %s1804_s1  ;;  %s1809_s12 = scalar_lea.hbm %s2523_s0, 512 }
  0x8c   : > { %p1810_p4 = scmp.lt.u32.totalorder %s2287_s16, %s2523_s0  ;;  %p1811_p10 = scmp.lt.u32.totalorder %s1809_s12, %s1804_s1 }
  0x8d   : > { %p1807_p5 = pnand %p1806_p8, %p1805_p7  ;;  %p1813_p9 = scmp.lt.u32.totalorder %s1804_s1, %s2287_s16 }
  0x8e   : > { %p1812_p13 = por %p1811_p10, %p1810_p4 }
  0x8f   : > { %p1808_p11 = pneg %p1807_p5 }
  0x90   : > { %p1814_p1 = por %p1813_p9, %p1812_p13 }
  0x92   : > { %p1815_p12 = pnand %p1814_p1, %p1808_p11 }
  0x94   : > { %1818 = shalt.err (!%p1815_p12)
}
  0x95   : > { %s1819_s20 = scalar_lea.vmem %s2282_s28, 128  ;;  %s2001_s18 = smov [#allocation3]  }
  0x96   : > { %p1820_p7 = scmp.ne.s32.totalorder %s2282_s28, %s1819_s20  ;;  %s1824_s13 = sshll.u32 %s2001_s18, 4  ;;  %s1825_s13 = int_to_ptr.vmem [resolvable:$false] %s1824_s13 }
  0x97   : > { %s1826_s22 = scalar_lea.vmem %s1825_s13, 256  ;;  %p1827_p3 = scmp.lt.s32.totalorder %s2282_s28, %s1825_s13 }
  0x98   : > { %p1822_p5 = pnand %p1820_p7, %p1806_p8  ;;  %p1828_p4 = scmp.lt.s32.totalorder %s1826_s22, %s1819_s20 }
  0x9a   : > { %p1823_p6 = pneg %p1822_p5  ;;  %p1829_p10 = por %p1828_p4, %p1827_p3 }
  0x9c   : > { %p1830_p13 = pnand %p1829_p10, %p1823_p6 }
  0x9e   : > { %1833 = shalt.err (!%p1830_p13)
}
  0x9f   : > { %1584 = dma.hbm_to_vmem [thread:$0]  (!%p2293_p0), %s2287_s16, 128, %s2282_s28, %s257_s15  }
  0xa0   : > { %s1834_s1 = scalar_lea.hbm %s2302_s10, 128  ;;  %p2589_p11 = scmp.ne.s32.totalorder %s2569_s21, 0 }
  0xa1   : > { %p1835_p8 = scmp.ne.s32.totalorder %s2302_s10, %s1834_s1  ;;  %s1839_s12 = scalar_lea.hbm %s2525_s2, 256 }
  0xa2   : > { %p2590_p9 = pneg %p2589_p11  ;;  %p1840_p3 = scmp.lt.u32.totalorder %s2302_s10, %s2525_s2 }
  0xa3   : > { %p1841_p6 = scmp.lt.u32.totalorder %s1839_s12, %s1834_s1  ;;  %p1843_p5 = scmp.lt.u32.totalorder %s1834_s1, %s2302_s10 }
  0xa4   : > { %p1837_p1 = pnand %p1835_p8, %p2590_p9 }
  0xa5   : > { %p1842_p7 = por %p1841_p6, %p1840_p3 }
  0xa6   : > { %p1838_p12 = pneg %p1837_p1 }
  0xa7   : > { %p1844_p4 = por %p1843_p5, %p1842_p7 }
  0xa9   : > { %p1845_p10 = pnand %p1844_p4, %p1838_p12 }
  0xab   : > { %1848 = shalt.err (!%p1845_p10)
}
  0xac   : > { %s1849_s28 = scalar_lea.vmem %s2305_s17, 128  ;;  %p2591_p13 = pmov %p2590_p9 }
  0xad   : > { %p1850_p0 = scmp.ne.s32.totalorder %s2305_s17, %s1849_s28  ;;  %s2002_s16 = smov [#allocation8]  }
  0xae   : > { %s1854_s15 = sshll.u32 %s2002_s16, 4  ;;  %s1855_s15 = int_to_ptr.vmem [resolvable:$false] %s1854_s15 }
  0xaf   : > { %p1852_p8 = pnand %p1850_p0, %p2591_p13  ;;  %s1856_s24 = scalar_lea.vmem %s1855_s15, 256 }
  0xb0   : > { %p1857_p1 = scmp.lt.s32.totalorder %s2305_s17, %s1855_s15  ;;  %p1858_p3 = scmp.lt.s32.totalorder %s1856_s24, %s1849_s28 }
  0xb1   : > { %p1853_p9 = pneg %p1852_p8 }
  0xb2   : > { %p1859_p6 = por %p1858_p3, %p1857_p1 }
  0xb4   : > { %p1860_p7 = pnand %p1859_p6, %p1853_p9 }
  0xb6   : > { %1863 = shalt.err (!%p1860_p7)
}
  0xb7   : > { %1590 = dma.hbm_to_vmem [thread:$0]  (!%p2589_p11), %s2302_s10, 128, %s2305_s17, %s2182_s6  }
  0xb8   : > { %p2592_p12 = scmp.ne.s32.totalorder %s2562_s9, 0 }
  0xb9   : > { %s2359_s20 = sand.u32 (!%p2592_p12), 1, %s1970_s25  }
  0xba   : > { %314 = sbr.rel (%p2592_p12) target bundleno = 1750 (0x6d6), region = 44  ;;  %s1432_s18 = sshll.u32 (!%p2592_p12), %s2359_s20, 3 }
  0xbb   : > { %s317_s13 = scalar_lea.sflag (!%p2592_p12), [#allocation4], %s2359_s20  ;;  %s2365_s22 = scalar_lea.vmem (!%p2592_p12), [#allocation3], %s1432_s18 }
  0xc1   : > { %1937 = dma.done.wait (%p2257_p2), %s317_s13, 128  }
  0xc2   : > { %1939 = vsyncadd (%p2257_p2), %s317_s13, 4294967168  ;;  %s2593_s9 = sld [smem:[#allocation17_spill]]  ;;  %s2594_s21 = sld [smem:[#allocation21_spill]] }
  0xc3   : > { %s325_s6 = sand.u32 1, %s2104_s8  }
  0xc4   : > { %s326_s1 = scalar_lea.sflag [#allocation7], %s325_s6 }
  0xc8   : > { %s327_s10 = sand.u32 1, %s2593_s9   ;;  %p2595_p11 = scmp.ne.s32.totalorder %s2594_s21, 0 }
  0xc9   : > { %s2373_s17 = sshll.u32 %s327_s10, 3 }
  0xca   : > { %s329_s11 = scalar_lea.vmem [#allocation6], %s2373_s17 }
  0xcb   : > { %1941 = dma.done.wait (%p2595_p11), %s326_s1, 256  }
  0xcc   : > { %1943 = vsyncadd (%p2595_p11), %s326_s1, 4294967040  ;;  %s338_s3 = scalar_lea.vmem [#allocation8], %s2373_s17  ;;  %p2596_p5 = scmp.eq.s32.totalorder %s2104_s8, 0 }
  0xce   : > { %1945 = dma.done.wait (%p2596_p5), [#allocation10], 1024   ;;  %p2597_p2 = pmov %p2596_p5 }
  0xcf   : > { %v2003_v0 = vmov 0.0|0.0   ;;  %vm2004_vm0 = vmmov 0   ;;  %v2005_v1 = vmov 0.0   ;;  %vm466_vm1 = vcmask 64512   ;;  %v386_v2 = vld [vmem:[#allocation9] sm:$0xff]  ;;  %v387_v3 = vld [vmem:[#allocation9 + $0x8] sm:$0xff] }
  0xd0   : > { %1947 = vsyncadd (%p2597_p2), [#allocation10], 4294966272  ;;  %1546 = vmatprep.subr.bf16.mxu0 %v2003_v0  ;;  %1492 = vmatprep.mubr.msk.f32.mxu0 %vm2004_vm0, %v2005_v1  ;;  %v388_v4 = vld [vmem:[#allocation9 + $0x10] sm:$0xff]  ;;  %v1547_v5 = vpack.c.bf16 %v387_v3, %v386_v2  ;;  %v389_v6 = vld [vmem:[#allocation9 + $0x18] sm:$0xff]  ;;  %vm390_vm2 = vcmask 261120   ;;  %s2006_s8 = smov 120  }
  0xd1   : > { %1495 = vmatprep.subr.mxu1 %v2005_v1  ;;  %1497 = vmatprep.mubr.msk.f32.mxu1 %vm2004_vm0, %v2005_v1  ;;  %v464_v7 = vld [vmem:[%s329_s11] sm:$0xff]  ;;  %v1550_v8 = vpack.c.bf16 %v389_v6, %v388_v4  ;;  %v385_v9 = vld [vmem:[%s2365_s22] sm:$0xff]  ;;  %s2007_s5 = smov 112   ;;  %s2008_s12 = smov 104   ;;  %vm809_vm3 = vcmask 130112   ;;  %vm988_vm4 = vcmask 195712  }
  0xd2   : > { %1496 = vmatpush3.xpose.msk.msra.mxu1 %vm466_vm1, %v464_v7  ;;  %1548 = vmatpush3.bf16.msra.mxu0 %v1547_v5  ;;  %v812_v12 = vld [vmem:[%s338_s3] sm:$0xff]  ;;  %s2009_s27 = smov 8   ;;  %s2010_s19 = smov 16   ;;  %vm1167_vm5 = vcmask 261312  }
  0xd3   : > { %1500 = vmatprep.subr.mxu1 %v2005_v1  ;;  %1549 = vmatprep.subr.bf16.mxu0 %v2003_v0  ;;  %s2598_s28 = sld [smem:[#allocation20_spill]]  ;;  %s2599_s16 = sld [smem:[#allocation19_spill]] }
  0xd4   : > { %s2011_s15 = smov 24   ;;  %s2600_s24 = sld [smem:[#allocation24_spill]] }
  0xd5   : > { %s2601_s6 = sld [smem:[#allocation29_spill]]  ;;  %s384_s17 = scalar_lea.vmem [#allocation12], %s1432_s18 }
  0xd6   : > { %1551 = vmatpush3.bf16.msra.mxu0 %v1550_v8  ;;  %s1271_s1 = sshll.u32 %s384_s17, 4  ;;  %s2012_s18 = smov [#allocation12]   ;;  %s2461_s1 = int_to_ptr.vmem [resolvable:$true] %s1271_s1 }
  0xd7   : > { %1515 = vmatprep.subr.mxu0 %v2005_v1 }
  0xd9   : > { %1493 = vmatmul.mubr.msk.f32.vlgmr.msra.gmra.mrb[0].mxu0 %vm390_vm2, %v385_v9  ;;  %s1454_s13 = sshll.u32 %s2598_s28, 1 }
  0xda   : > { %1517 = vmatprep.mubr.msk.f32.mxu0 %vm2004_vm0, %v2005_v1  ;;  %s1267_s22 = sadd.s32 %s2599_s16, %s1454_s13  ;;  %p2603_p10 = scmp.ne.s32.totalorder %s2600_s24, 0 }
  0xdb   : > { %s1455_s10 = sshll.u32 %s1267_s22, 7 }
 0x1ac   : > { %v460_v10 = vpop.f32.mrb[0].mxu0 }
 0x1ad   : > { %634 = vrot.lane.b32.xlu1 %v460_v10, %s2006_s8  ;;  %v1494_v11 = vpop.f32.mrb[1].mxu0  ;;  %1498 = vmatmul.mubr.msk.f32.vlgmr.msra.gmra.mrb[0].mxu1 %vm466_vm1, %v460_v10 }
 0x1ae   : > { %1502 = vmatprep.mubr.msk.f32.mxu1 %vm2004_vm0, %v2005_v1  ;;  %1501 = vmatpush3.msra.mxu1 %v812_v12 }
 0x1af   : > { %1505 = vmatprep.subr.mxu1 %v2005_v1 }
 0x1b1   : > { %816 = vrot.lane.b32.xlu1 %v464_v7, %s2007_s5 }
 0x1b5   : > { %813 = vrot.lane.b32.xlu1 %v460_v10, %s2007_s5 }
 0x1b9   : > { %995 = vrot.lane.b32.xlu1 %v464_v7, %s2008_s12 }
 0x1bd   : > { %992 = vrot.lane.b32.xlu1 %v460_v10, %s2008_s12 }
 0x1c1   : > { %907 = vrot.lane.b32.xlu1 %v812_v12, %s2007_s5 }
 0x21f   : > { %v635_v13 = vpop.permute.xlu1 %634 }
 0x223   : > { %v817_v14 = vpop.permute.xlu1 %816 }
 0x224   : > { %1516 = vmatpush3.xpose.msk.msra.mxu0 %vm466_vm1, %v817_v14 }
 0x225   : > { %1525 = vmatprep.subr.mxu0 %v2005_v1 }
 0x227   : > { %v814_v15 = vpop.permute.xlu1 %813 }
 0x228   : > { %1518 = vmatmul.mubr.msk.f32.vlgmr.msra.gmra.mrb[2].mxu0 %vm466_vm1, %v814_v15  ;;  %v1172_v15 = vld [vmem:[#allocation11 + $0x10] sm:$0xff] }
 0x229   : > { %1527 = vmatprep.mubr.msk.f32.mxu0 %vm2004_vm0, %v2005_v1 }
 0x22b   : > { %v996_v16 = vpop.permute.xlu1 %995 }
 0x22c   : > { %1526 = vmatpush3.xpose.msk.msra.mxu0 %vm466_vm1, %v996_v16  ;;  %v1173_v16 = vld [vmem:[#allocation11 + $0x18] sm:$0xff] }
 0x22d   : > { %1552 = vmatprep.subr.bf16.mxu0 %v2003_v0 }
 0x22f   : > { %v993_v17 = vpop.permute.xlu1 %992 }
 0x230   : > { %1528 = vmatmul.mubr.msk.f32.vlgmr.msra.gmra.mrb[4].mxu0 %vm466_vm1, %v993_v17 }
 0x231   : > { %1543 = vmatprep.mubr.msk.f32.mxu0 %vm2004_vm0, %v2005_v1 }
 0x233   : > { %v908_v47 = vpop.permute.xlu1 %907 }
 0x280   : > { %v539_v18 = vpop.f32.mrb[0].mxu1 }
 0x281   : > { %v543_v19 = vmul.f32 0.35355338, %v539_v18  ;;  %v1499_v20 = vpop.f32.mrb[1].mxu1 }
 0x283   : > { %v544_v21 = vsel %vm466_vm1, %v543_v19, -inf }
 0x284   : > { %545 = vmax.xlane.f32.xlu0 %v544_v21  ;;  %v1556_v21 = vpack.c.bf16 %v1173_v16, %v1172_v15 }
 0x29a   : > { %637 = vrot.lane.b32.xlu0 %v464_v7, %s2006_s8 }
 0x2fb   : > { %v888_v22 = vpop.f32.mrb[2].mxu0 }
 0x2fc   : > { %v892_v23 = vmul.f32 0.35355338, %v888_v22  ;;  %v1519_v24 = vpop.f32.mrb[3].mxu0 }
 0x2fe   : > { %v893_v25 = vsel %vm466_vm1, %v892_v23, -inf }
 0x2ff   : > { %894 = vmax.xlane.f32.xlu0 %v893_v25 }
 0x303   : > { %v1067_v26 = vpop.f32.mrb[4].mxu0 }
 0x304   : > { %v1071_v27 = vmul.f32 0.35355338, %v1067_v26  ;;  %v1529_v28 = vpop.f32.mrb[5].mxu0 }
 0x306   : > { %v1072_v29 = vsel %vm466_vm1, %v1071_v27, -inf }
 0x307   : > { %1073 = vmax.xlane.f32.xlu1 %v1072_v29 }
 0x311   : > { %v546_v30 = vpop.xlane.xlu0 %545 }
 0x312   : > { %v547_v31 = vsub.f32 %v543_v19, %v546_v30 }
 0x314   : > { %v548_v32 = vmul.f32 1.442695, %v547_v31 }
 0x315   : > { %728 = vrot.lane.b32.xlu0 %v812_v12, %s2006_s8  ;;  %v638_v33 = vpop.permute.xlu0 %637  ;;  %s2602_s8 = sld [smem:[#allocation30_spill]] }
 0x316   : > { %1702 = vpow2.f32 %v548_v32 }
 0x31b   : > { %s2459_s5 = scalar_lea.hbm %s2602_s8, %s1455_s10 }
 0x320   : > { %v1703_v34 = vpop.eup %1702 }
 0x321   : > { %1503 = vmatmul.mubr.msk.f32.vlgmr.msra.gmra.mrb[2].mxu1 %vm466_vm1, %v1703_v34  ;;  %v550_v59 = vsel %vm466_vm1, %v1703_v34, 0.0 }
 0x322   : > { %1506 = vmatpush3.xpose.msk.msra.mxu1 %vm466_vm1, %v638_v33  ;;  %1507 = vmatprep.mubr.msk.f32.mxu1 %vm2004_vm0, %v2005_v1 }
 0x323   : > { %1510 = vmatprep.subr.mxu1 %v2005_v1 }
 0x325   : > { %1508 = vmatmul.mubr.msk.f32.vlgmr.msra.gmra.mrb[4].mxu1 %vm466_vm1, %v635_v13  ;;  %v1171_v13 = vld [vmem:[#allocation11 + $0x8] sm:$0xff] }
 0x326   : > { %1512 = vmatprep.mubr.msk.f32.mxu1 %vm2004_vm0, %v2005_v1 }
 0x38c   : > { %v895_v41 = vpop.xlane.xlu0 %894 }
 0x38d   : > { %v896_v43 = vsub.f32 %v892_v23, %v895_v41 }
 0x38f   : > { %v897_v44 = vmul.f32 1.442695, %v896_v43 }
 0x390   : > { %v729_v42 = vpop.permute.xlu0 %728 }
 0x391   : > { %1511 = vmatpush3.msra.mxu1 %v729_v42  ;;  %1704 = vpow2.f32 %v897_v44 }
 0x392   : > { %1520 = vmatprep.subr.mxu1 %v2005_v1 }
 0x394   : > { %v1074_v48 = vpop.xlane.xlu1 %1073 }
 0x395   : > { %v1075_v49 = vsub.f32 %v1071_v27, %v1074_v48 }
 0x397   : > { %v1076_v52 = vmul.f32 1.442695, %v1075_v49 }
 0x39b   : > { %v1705_v45 = vpop.eup %1704 }
 0x39c   : > { %v899_v46 = vsel %vm466_vm1, %v1705_v45, 0.0 }
 0x3f4   : > { %v626_v35 = vpop.f32.mrb[2].mxu1 }
 0x3f5   : > { %v1504_v36 = vpop.f32.mrb[3].mxu1 }
 0x3f6   : > { %v1451_v36 = vld [vmem:[%s2601_s6] ss:$0 sm:$0xff] }
 0x3f8   : > { %v709_v37 = vpop.f32.mrb[4].mxu1 }
 0x3f9   : > { %v713_v38 = vmul.f32 0.35355338, %v709_v37  ;;  %v1509_v39 = vpop.f32.mrb[5].mxu1 }
 0x3fb   : > { %v714_v40 = vsel %vm466_vm1, %v713_v38, -inf }
 0x3fc   : > { %715 = vmax.xlane.f32.xlu1 %v714_v40 }
 0x40d   : > { %1086 = vrot.lane.b32.xlu1 %v812_v12, %s2008_s12  ;;  %v1170_v12 = vld [vmem:[#allocation11] sm:$0xff]  ;;  %s1256_s12 = scalar_lea.sflag [#allocation5], %s2359_s20 }
 0x40e   : > { %v1553_v14 = vpack.c.bf16 %v1171_v13, %v1170_v12 }
 0x410   : > { %1554 = vmatpush3.bf16.msra.mxu0 %v1553_v14 }
 0x411   : > { %1555 = vmatprep.subr.bf16.mxu0 %v2003_v0 }
 0x414   : > { %1557 = vmatpush3.bf16.msra.mxu0 %v1556_v21 }
 0x431   : > { %900 = vadd.xlane.f32.xlu1 %v899_v46 }
 0x489   : > { %v716_v50 = vpop.xlane.xlu1 %715 }
 0x48a   : > { %v717_v51 = vsub.f32 %v713_v38, %v716_v50 }
 0x48c   : > { %v718_v53 = vmul.f32 1.442695, %v717_v51 }
 0x48d   : > { %v1087_v57 = vpop.permute.xlu1 %1086 }
 0x48e   : > { %1706 = vpow2.f32 %v718_v53 }
 0x48f   : > { %1708 = vpow2.f32 %v1076_v52 }
 0x498   : > { %v1707_v54 = vpop.eup %1706 }
 0x499   : > { %1513 = vmatmul.mubr.msk.f32.vlgmr.msra.gmra.mrb[6].mxu1 %vm466_vm1, %v1707_v54  ;;  %v720_v55 = vsel %vm466_vm1, %v1707_v54, 0.0  ;;  %v1709_v56 = vpop.eup %1708 }
 0x49a   : > { %1521 = vmatpush3.msra.mxu1 %v908_v47  ;;  %721 = vadd.xlane.f32.xlu0 %v720_v55  ;;  %v1078_v58 = vsel %vm466_vm1, %v1709_v56, 0.0 }
 0x49b   : > { %1522 = vmatprep.mubr.msk.f32.mxu1 %vm2004_vm0, %v2005_v1  ;;  %1530 = vmatprep.subr.mxu1 %v2005_v1 }
 0x49d   : > { %1523 = vmatmul.mubr.msk.f32.vlgmr.msra.gmra.mrb[8].mxu1 %vm466_vm1, %v1705_v45 }
 0x49e   : > { %1531 = vmatpush3.msra.mxu1 %v1087_v57  ;;  %1079 = vadd.xlane.f32.xlu0 %v1078_v58 }
 0x49f   : > { %1532 = vmatprep.mubr.msk.f32.mxu1 %vm2004_vm0, %v2005_v1 }
 0x4a1   : > { %1533 = vmatmul.mubr.msk.f32.vlgmr.msra.gmra.mrb[10].mxu1 %vm466_vm1, %v1709_v56 }
 0x4a2   : > { %551 = vadd.xlane.f32.xlu0 %v550_v59 }
 0x4be   : > { %v901_v6 = vpop.xlane.xlu1 %900 }
 0x527   : > { %v722_v60 = vpop.xlane.xlu0 %721 }
 0x52b   : > { %v1080_v61 = vpop.xlane.xlu0 %1079 }
 0x52f   : > { %v552_v62 = vpop.xlane.xlu0 %551 }
 0x530   : > { %1710 = vrcp.f32 %v552_v62 }
 0x531   : > { %1712 = vrcp.f32 %v722_v60 }
 0x532   : > { %1714 = vrcp.f32 %v901_v6 }
 0x533   : > { %1716 = vrcp.f32 %v1080_v61 }
 0x53a   : > { %v1711_v63 = vpop.eup %1710 }
 0x53b   : > { %v554_v2 = vmul.f32 %v1711_v63, %v552_v62  ;;  %v1713_v1 = vpop.eup %1712 }
 0x53c   : > { %v724_v7 = vmul.f32 %v1713_v1, %v722_v60  ;;  %v1715_v8 = vpop.eup %1714 }
 0x53d   : > { %v555_v3 = vsub.f32 2.0, %v554_v2  ;;  %v903_v9 = vmul.f32 %v1715_v8, %v901_v6  ;;  %v1717_v11 = vpop.eup %1716 }
 0x53e   : > { %v725_v10 = vsub.f32 2.0, %v724_v7  ;;  %v1082_v18 = vmul.f32 %v1717_v11, %v1080_v61 }
 0x53f   : > { %v556_v4 = vmul.f32 %v1711_v63, %v555_v3  ;;  %v904_v17 = vsub.f32 2.0, %v903_v9 }
 0x540   : > { %v726_v19 = vmul.f32 %v1713_v1, %v725_v10  ;;  %v1083_v24 = vsub.f32 2.0, %v1082_v18 }
 0x541   : > { %v630_v5 = vmul.f32 %v626_v35, %v556_v4  ;;  %v905_v25 = vmul.f32 %v1715_v8, %v904_v17 }
 0x542   : > { %v1084_v29 = vmul.f32 %v1717_v11, %v1083_v24 }
 0x543   : > { %631 = vst.msk [vmem:[#allocation2] sm:$0xff] %vm466_vm1, %v630_v5 }
 0x56c   : > { %v800_v20 = vpop.f32.mrb[6].mxu1 }
 0x56d   : > { %v804_v22 = vmul.f32 %v800_v20, %v726_v19  ;;  %v1514_v23 = vpop.f32.mrb[7].mxu1 }
 0x56f   : > { %806 = vrot.lane.b32.xlu1 %v804_v22, %s2009_s27  ;;  %s1864_s27 = scalar_lea.vmem %s2461_s1, 128 }
 0x570   : > { %v979_v26 = vpop.f32.mrb[8].mxu1  ;;  %p1865_p4 = scmp.ne.s32.totalorder %s2461_s1, %s1864_s27 }
 0x571   : > { %v983_v27 = vmul.f32 %v979_v26, %v905_v25  ;;  %v1524_v28 = vpop.f32.mrb[9].mxu1 }
 0x572   : > { %p1866_p0 = pnand %p1865_p4, %p2603_p10 }
 0x573   : > { %985 = vrot.lane.b32.xlu0 %v983_v27, %s2010_s19  ;;  %s1868_s19 = sshll.u32 %s2012_s18, 4  ;;  %s1869_s19 = int_to_ptr.vmem [resolvable:$false] %s1868_s19 }
 0x574   : > { %v1158_v30 = vpop.f32.mrb[10].mxu1  ;;  %p1867_p13 = pneg %p1866_p0  ;;  %s1870_s28 = scalar_lea.vmem %s1869_s19, 256 }
 0x575   : > { %v1162_v31 = vmul.f32 %v1158_v30, %v1084_v29  ;;  %v1534_v32 = vpop.f32.mrb[11].mxu1  ;;  %p1871_p8 = scmp.lt.s32.totalorder %s2461_s1, %s1869_s19  ;;  %p1872_p9 = scmp.lt.s32.totalorder %s1870_s28, %s1864_s27 }
 0x577   : > { %1164 = vrot.lane.b32.xlu1 %v1162_v31, %s2011_s15  ;;  %p1873_p1 = por %p1872_p9, %p1871_p8 }
 0x579   : > { %p1874_p3 = pnand %p1873_p1, %p1867_p13 }
 0x5e1   : > { %v807_v0 = vpop.permute.xlu1 %806 }
 0x5e2   : > { %810 = vst.msk [vmem:[#allocation2] sm:$0xff] %vm809_vm3, %v807_v0 }
 0x5e5   : > { %v986_v33 = vpop.permute.xlu0 %985 }
 0x5e6   : > { %989 = vst.msk [vmem:[#allocation2] sm:$0xff] %vm988_vm4, %v986_v33 }
 0x5e9   : > { %v1165_v34 = vpop.permute.xlu1 %1164 }
 0x5ea   : > { %1168 = vst.msk [vmem:[#allocation2] sm:$0xff] %vm1167_vm5, %v1165_v34 }
 0x5f1   : > { %v1169_v35 = vld [vmem:[#allocation2] sm:$0xff] }
 0x5f2   : > { %1544 = vmatmul.mubr.msk.f32.vlgmr.msra.gmra.mrb[6].mxu0 %vm390_vm2, %v1169_v35 }
 0x6c5   : > { %v1250_v37 = vpop.f32.mrb[6].mxu0 }
 0x6c6   : > { %v1251_v38 = vadd.f32 %v1451_v36, %v1250_v37  ;;  %v1545_v39 = vpop.f32.mrb[7].mxu0 }
 0x6c8   : > { %1254 = vst.msk [vmem:[%s384_s17] sm:$0xff] %vm390_vm2, %v1251_v38 }
 0x6c9   : > { %1877 = shalt.err (!%p1874_p3)
}
 0x6ca   : > { %s1878_s20 = scalar_lea.hbm %s2459_s5, 128  ;;  %s1882_s13 = scalar_lea.hbm %s2602_s8, 512 }
 0x6cb   : > { %p1879_p6 = scmp.ne.s32.totalorder %s2459_s5, %s1878_s20  ;;  %p1883_p11 = scmp.lt.u32.totalorder %s2459_s5, %s2602_s8 }
 0x6cc   : > { %p1884_p5 = scmp.lt.u32.totalorder %s1882_s13, %s1878_s20  ;;  %p1886_p4 = scmp.lt.u32.totalorder %s1878_s20, %s2459_s5 }
 0x6cd   : > { %p1880_p7 = pnand %p1879_p6, %p2603_p10 }
 0x6ce   : > { %p1885_p2 = por %p1884_p5, %p1883_p11 }
 0x6cf   : > { %p1881_p12 = pneg %p1880_p7 }
 0x6d0   : > { %p1887_p0 = por %p1886_p4, %p1885_p2 }
 0x6d2   : > { %p1888_p13 = pnand %p1887_p0, %p1881_p12 }
 0x6d4   : > { %1891 = shalt.err (!%p1888_p13)
}
 0x6d5   : > { %1572 = dma.vmem_to_hbm [thread:$0]  (%p2603_p10), %s2461_s1, 128, %s2459_s5, %s1256_s12  }
 0x6d6 PF: > { %s2604_s21 = sld [smem:[#allocation18_spill]]  ;;  %s2605_s6 = sld [smem:[#allocation25_spill]] }
 0x6d7   : > { %p1600_p8 = scmp.ge.s32.totalorder %s1994_s7, 2 }
 0x6dc   : > { %s1283_s10 = sand.u32 1, %s2604_s21   ;;  %p2606_p9 = scmp.ne.s32.totalorder %s2605_s6, 0 }
 0x6dd   : > { %s1284_s17 = scalar_lea.sflag [#allocation5], %s1283_s10 }
 0x6de   : > { %p1592_p1 = pnand %p1600_p8, %p2606_p9 }
 0x6e0   : > { %1949 = dma.done.wait (!%p1592_p1), %s1284_s17, 128  }
 0x6e1   : > { %1951 = vsyncadd (!%p1592_p1), %s1284_s17, 4294967168  ;;  %s26_s7 = sadd.s32 1, %s1994_s7   ;;  %s2607_s21 = sld [smem:[#allocation17_spill]] }
 0x6e2   : > { %p23_p3 = scmp.ge.s32.totalorder %s26_s7, 6   ;;  %s2608_s1 = sld [smem:[#allocation22_spill]] }
 0x6e3   : > { %s2609_s11 = sld [smem:[#allocation23_spill]]  ;;  %s2610_s22 = smov %s1962_s23 }
 0x6e4   : > { %s2611_s23 = smov %s2275_s4  ;;  %s2612_s24 = smov %s1970_s25 }
 0x6e5   : > { %s2613_s25 = smov %s1974_s26  ;;  %s2614_s26 = smov %s2278_s14 }
 0x6e6   : > { %s2615_s27 = smov %s1986_s29  ;;  %s2616_s28 = smov %s1990_s30 }
 0x6e7   :  { %25 = sbr.rel (!%p23_p3) target bundleno = 18 (0x12), region = 121 }
 0x6e8   : > { %s2617_s29 = smov %s2608_s1 }
 0x6e9   : > { %s2618_s30 = smov %s2609_s11 }
 0x6ee   :  { %1289 = vsyncpa [#allocation4], 1 }
 0x6ef   :  { %1291 = vsyncpa [#allocation4 + $0x1], 1 }
 0x6f0   :  { %1292 = vsyncpa [#allocation7], 1 }
 0x6f1   :  { %1294 = vsyncpa [#allocation7 + $0x1], 1 }
 0x6f2   :  { %1295 = vsyncpa [#allocation10], 1 }
 0x6f3   :  { %1296 = vsyncpa [#allocation5], 1 }
 0x6f4   :  { %1298 = vsyncpa [#allocation5 + $0x1], 1 }

</bundles_post_ra>
